<compile_context>
chip_gen: v7x
topology: tpu7x:2x2x1
jax: 0.10.0
libtpu: 0.0.40
codegen_flags: <defaults>
</compile_context>

<pallas_src>
import functools

import jax
import jax.numpy as jnp
from jax.experimental import pallas as pl
from jax.experimental.pallas import tpu as pltpu


def _round_up(v, m):
    return -(-v // m) * m


# --------------------------------------------------------------------------- #
# Kernel: one batch tile of the linearized 2-layer tanh MLP, 2 MXU matmuls.
#   layer 1: [pre0 | dpre] = x @ [W1_0 | dW1] + [b1_0 | db1]
#   tangent: dh = (1 - tanh(pre0)^2) * dpre
#   layer 2: out = [dh | h] @ [W2_0 ; W2] + b2
#            (= (h@W2_0 + b2_0) + (dh@W2_0 + h@dW2 + db2), the Taylor sum)
# --------------------------------------------------------------------------- #
def linearized_mlp_kernel(x_ref, w1p_ref, b1p_ref, w2p_ref, b2_ref, o_ref, *, h_pad):
    x = x_ref[...]                                               # [bB, Din]

    pre_both = (jnp.dot(x, w1p_ref[...], preferred_element_type=jnp.float32)
                + b1p_ref[...])                                  # [bB, 2*h_pad]
    pre0 = pre_both[:, :h_pad]          # primal pre-activation (128-lane aligned)
    dpre = pre_both[:, h_pad:]          # tangent pre-act x@dW1+db1 (no cancellation)

    h = jnp.tanh(pre0)                  # EUP
    dh = (1.0 - h * h) * dpre           # VPU (tanh'(pre0) * dpre)

    g = jnp.concatenate([dh, h], axis=-1)                        # 128-lane boundary
    o_ref[...] = (jnp.dot(g, w2p_ref[...], preferred_element_type=jnp.float32)
                  + b2_ref[...])


# --------------------------------------------------------------------------- #
# Parameter packing (hoist out of the per-forward path when params are reused).
# --------------------------------------------------------------------------- #
def pack_linearized_params(params0, params):
    w1_0, b1_0, w2_0, b2_0 = [jnp.asarray(p, jnp.float32) for p in params0]
    w1, b1, w2, b2 = [jnp.asarray(p, jnp.float32) for p in params]

    Din, H = w1_0.shape
    C = w2_0.shape[1]
    H_PAD = _round_up(H, 128)           # lane-align each packed half
    C_PAD = _round_up(C, 128)           # lane-dense output stores

    def pad_cols(a, n):
        return jnp.pad(a, ((0, 0), (0, n - a.shape[1])))

    def pad_rows(a, n):
        return jnp.pad(a, ((0, n - a.shape[0]), (0, 0)))

    # Layer 1: primal weights + tangent (delta) weights, packed along N.
    dw1 = w1 - w1_0
    db1 = b1 - b1_0
    w1_pack = jnp.concatenate(
        [pad_cols(w1_0, H_PAD), pad_cols(dw1, H_PAD)], axis=1)          # [Din, 2*H_PAD]
    b1_pack = jnp.concatenate(
        [jnp.pad(b1_0, (0, H_PAD - H)), jnp.pad(db1, (0, H_PAD - H))]
    ).reshape(1, 2 * H_PAD)

    # Layer 2: out = dh @ W2_0 + h @ W2 + b2   (packed along K).
    w2_pack = jnp.concatenate(
        [pad_rows(pad_cols(w2_0, C_PAD), H_PAD),
         pad_rows(pad_cols(w2, C_PAD), H_PAD)], axis=0)                 # [2*H_PAD, C_PAD]
    b2_pad = jnp.pad(b2, (0, C_PAD - C)).reshape(1, C_PAD)

    packed = (w1_pack, b1_pack, w2_pack, b2_pad)
    meta = (Din, H_PAD, C, C_PAD)
    return packed, meta


# --------------------------------------------------------------------------- #
# Batch tile selection.
# --------------------------------------------------------------------------- #
def _choose_block_b(B, cap=512):
    """Preference order:
       1. no wrapper-side jnp.pad of x (tile divides B, or tile == full B),
       2. tiles as large as possible (HBM-bound kernel),
       3. grid length >= 2 so a v7x chip can use both TensorCores."""
    if B <= cap:
        if B % 8 == 0 and B > 8:
            bb = max(8, _round_up(B // 2, 8))   # aim for >= 2 grid steps
            while bb >= 8 and B % bb != 0:
                bb -= 8
            if bb >= 8:
                return bb
        return B                                 # one full-batch tile, no padding
    bb = cap                                     # B > cap: largest mult-of-8 divisor
    while bb >= 8 and B % bb != 0:
        bb -= 8
    return bb if bb >= 8 else cap                # last resort: pad the ragged tail


# --------------------------------------------------------------------------- #
# Forward on pre-packed params.
# --------------------------------------------------------------------------- #
def linearized_mlp_forward(x_nchw, packed, meta, *, block_b_cap=512):
    w1_pack, b1_pack, w2_pack, b2_pad = packed
    Din, H_PAD, C, C_PAD = meta

    B = x_nchw.shape[0]
    x_flat = x_nchw.reshape(B, -1).astype(jnp.float32)           # [B, Din]
    assert x_flat.shape[1] == Din

    block_b = _choose_block_b(B, block_b_cap)
    grid_len = pl.cdiv(B, block_b)
    B_pad = grid_len * block_b
    if B_pad != B:
        # TODO(synk): a second small pallas_call for the ragged tail would avoid
        # this full read+write copy of x; only hit for awkward batch sizes.
        x_flat = jnp.pad(x_flat, ((0, B_pad - B), (0, 0)))

    kernel = functools.partial(linearized_mlp_kernel, h_pad=H_PAD)

    def build(single_buffer_weights):
        pm = ({"pipeline_mode": pl.Buffered(1)} if single_buffer_weights else {})
        return pl.pallas_call(
            kernel,
            out_shape=jax.ShapeDtypeStruct((B_pad, C_PAD), jnp.float32),
            grid=(grid_len,),
            in_specs=[
                pl.BlockSpec((block_b, Din), lambda i: (i, 0)),           # x tile
                pl.BlockSpec((Din, 2 * H_PAD), lambda i: (0, 0), **pm),   # packed W1 (resident)
                pl.BlockSpec((1, 2 * H_PAD), lambda i: (0, 0), **pm),     # packed b1
                pl.BlockSpec((2 * H_PAD, C_PAD), lambda i: (0, 0), **pm), # packed W2 (resident)
                pl.BlockSpec((1, C_PAD), lambda i: (0, 0), **pm),         # b2
            ],
            out_specs=pl.BlockSpec((block_b, C_PAD), lambda i: (i, 0)),
            compiler_params=pltpu.CompilerParams(
                dimension_semantics=("parallel",)),
        )

    args = (x_flat, w1_pack, b1_pack, w2_pack, b2_pad)
    try:
        out = build(True)(*args)
    except Exception:
        # Fallback if this JAX build rejects Buffered(1) on resident blocks.
        out = build(False)(*args)
    return out[:B, :C]


def linearized_model_forward(x_nchw, params0, params):
    """out = f(params0, x) + Jf(params0, x) . (params - params0)."""
    packed, meta = pack_linearized_params(params0, params)
    return linearized_mlp_forward(x_nchw, packed, meta)


# --------------------------------------------------------------------------- #
# Pure-JAX reference using jax.jvp (mirrors the PyTorch forward).
# --------------------------------------------------------------------------- #
def _reference(x_nchw, params0, params):
    def f(p, x):
        w1, b1, w2, b2 = p
        xf = x.reshape(x.shape[0], -1)
        h = jnp.tanh(xf @ w1 + b1)
        return h @ w2 + b2

    dparams = tuple(p - p0 for p, p0 in zip(params, params0))
    out, dp = jax.jvp(lambda p: f(p, x_nchw), (tuple(params0),), (dparams,))
    return out + dp


if __name__ == "__main__":
    key = jax.random.PRNGKey(0)
    B, Cch, Himg, Wimg = 2, 4, 16, 16
    Din = Cch * Himg * Wimg                # 1024
    Hid = 32
    Cls = 8

    ks = jax.random.split(key, 9)
    x = jax.random.normal(ks[0], (B, Cch, Himg, Wimg), jnp.float32)

    # params0: the linearization point (init_model); params: trainable params.
    w1_0 = jax.random.normal(ks[1], (Din, Hid), jnp.float32) * 0.05
    b1_0 = jax.random.normal(ks[2], (Hid,), jnp.float32) * 0.05
    w2_0 = jax.random.normal(ks[3], (Hid, Cls), jnp.float32) * 0.05
    b2_0 = jax.random.normal(ks[4], (Cls,), jnp.float32) * 0.05
    params0 = (w1_0, b1_0, w2_0, b2_0)

    w1 = w1_0 + 0.02 * jax.random.normal(ks[5], (Din, Hid), jnp.float32)
    b1 = b1_0 + 0.02 * jax.random.normal(ks[6], (Hid,), jnp.float32)
    w2 = w2_0 + 0.02 * jax.random.normal(ks[7], (Hid, Cls), jnp.float32)
    b2 = b2_0 + 0.02 * jax.random.normal(ks[8], (Cls,), jnp.float32)
    params = (w1, b1, w2, b2)

    out = jax.block_until_ready(linearized_model_forward(x, params0, params))
    ref = jax.block_until_ready(_reference(x, params0, params))

    assert out.shape == (B, Cls)
    assert jnp.allclose(out, ref, atol=1e-4, rtol=1e-4), (out, ref)
    print("KERNEL_OK")
</pallas_src>

<mosaic_0001>
module attributes {stable_mosaic.version = 11 : i64} {
  func.func @linearized_mlp_kernel(%arg0: i32, %arg1: memref<2x1024xf32, #tpu.memory_space<vmem>>, %arg2: memref<1024x256xf32, #tpu.memory_space<vmem>>, %arg3: memref<1x256xf32, #tpu.memory_space<vmem>>, %arg4: memref<256x128xf32, #tpu.memory_space<vmem>>, %arg5: memref<1x128xf32, #tpu.memory_space<vmem>>, %arg6: memref<2x128xf32, #tpu.memory_space<vmem>>) attributes {dimension_semantics = [#tpu.dimension_semantics<parallel>], iteration_bounds = array<i64: 1>, scalar_prefetch = 0 : i64, scratch_operands = 0 : i64, tpu.core_type = #tpu.core_type<tc>, window_params = [{transform_indices = @transform_0, window_bounds = array<i64: 2, 1024>}, {pipeline_mode = #tpu.pipeline_mode<synchronous>, transform_indices = @transform_1, window_bounds = array<i64: 1024, 256>}, {pipeline_mode = #tpu.pipeline_mode<synchronous>, transform_indices = @transform_2, window_bounds = array<i64: 1, 256>}, {pipeline_mode = #tpu.pipeline_mode<synchronous>, transform_indices = @transform_3, window_bounds = array<i64: 256, 128>}, {pipeline_mode = #tpu.pipeline_mode<synchronous>, transform_indices = @transform_4, window_bounds = array<i64: 1, 128>}, {transform_indices = @transform_5, window_bounds = array<i64: 2, 128>}]} {
    %c0 = arith.constant 0 : index
    %c0_0 = arith.constant 0 : index
    %0 = vector.load %arg1[%c0, %c0_0] : memref<2x1024xf32, #tpu.memory_space<vmem>>, vector<2x1024xf32>
    %c0_1 = arith.constant 0 : index
    %c0_2 = arith.constant 0 : index
    %1 = vector.load %arg2[%c0_1, %c0_2] : memref<1024x256xf32, #tpu.memory_space<vmem>>, vector<1024x256xf32>
    %cst = arith.constant dense<0.000000e+00> : vector<2x256xf32>
    %2 = tpu.matmul %0, %1, %cst {dimension_numbers = #tpu.dot_dimension_numbers<[1], [0], [0], [1], [0, 0, 1, 1], [], []>} : vector<2x1024xf32>, vector<1024x256xf32>, vector<2x256xf32> -> vector<2x256xf32>
    %c0_3 = arith.constant 0 : index
    %c0_4 = arith.constant 0 : index
    %3 = vector.load %arg3[%c0_3, %c0_4] : memref<1x256xf32, #tpu.memory_space<vmem>>, vector<1x256xf32>
    %4 = vector.broadcast %3 : vector<1x256xf32> to vector<2x256xf32>
    %5 = arith.addf %2, %4 : vector<2x256xf32>
    %6 = vector.extract_strided_slice %5 {offsets = [0, 0], sizes = [2, 128], strides = [1, 1]} : vector<2x256xf32> to vector<2x128xf32>
    %7 = vector.extract_strided_slice %5 {offsets = [0, 128], sizes = [2, 128], strides = [1, 1]} : vector<2x256xf32> to vector<2x128xf32>
    %8 = math.tanh %6 : vector<2x128xf32>
    %9 = arith.mulf %8, %8 : vector<2x128xf32>
    %cst_5 = arith.constant 1.000000e+00 : f32
    %10 = vector.broadcast %cst_5 : f32 to vector<2x128xf32>
    %11 = arith.subf %10, %9 : vector<2x128xf32>
    %12 = arith.mulf %11, %7 : vector<2x128xf32>
    %13 = tpu.concatenate %12, %8 in 1 : vector<2x128xf32>, vector<2x128xf32> -> vector<2x256xf32>
    %c0_6 = arith.constant 0 : index
    %c0_7 = arith.constant 0 : index
    %14 = vector.load %arg4[%c0_6, %c0_7] : memref<256x128xf32, #tpu.memory_space<vmem>>, vector<256x128xf32>
    %cst_8 = arith.constant dense<0.000000e+00> : vector<2x128xf32>
    %15 = tpu.matmul %13, %14, %cst_8 {dimension_numbers = #tpu.dot_dimension_numbers<[1], [0], [0], [1], [0, 0, 1, 1], [], []>} : vector<2x256xf32>, vector<256x128xf32>, vector<2x128xf32> -> vector<2x128xf32>
    %c0_9 = arith.constant 0 : index
    %c0_10 = arith.constant 0 : index
    %16 = vector.load %arg5[%c0_9, %c0_10] : memref<1x128xf32, #tpu.memory_space<vmem>>, vector<1x128xf32>
    %17 = vector.broadcast %16 : vector<1x128xf32> to vector<2x128xf32>
    %18 = arith.addf %15, %17 : vector<2x128xf32>
    %c0_11 = arith.constant 0 : index
    %c0_12 = arith.constant 0 : index
    %19 = vector.load %arg6[%c0_11, %c0_12] : memref<2x128xf32, #tpu.memory_space<vmem>>, vector<2x128xf32>
    tpu.vector_store %arg6[%c0_11, %c0_12], %18 {strides = array<i32>} : memref<2x128xf32, #tpu.memory_space<vmem>>, vector<2x128xf32>,
    return
  }
  func.func @transform_0(%arg0: i32) -> (i32, i32) {
    %c0_i32 = arith.constant 0 : i32
    %c0_i32_0 = arith.constant 0 : i32
    return %arg0, %c0_i32 : i32, i32
  }
  func.func @transform_1(%arg0: i32) -> (i32, i32) {
    %c0_i32 = arith.constant 0 : i32
    %c0_i32_0 = arith.constant 0 : i32
    %c0_i32_1 = arith.constant 0 : i32
    return %c0_i32, %c0_i32_0 : i32, i32
  }
  func.func @transform_2(%arg0: i32) -> (i32, i32) {
    %c0_i32 = arith.constant 0 : i32
    %c0_i32_0 = arith.constant 0 : i32
    %c0_i32_1 = arith.constant 0 : i32
    return %c0_i32, %c0_i32_0 : i32, i32
  }
  func.func @transform_3(%arg0: i32) -> (i32, i32) {
    %c0_i32 = arith.constant 0 : i32
    %c0_i32_0 = arith.constant 0 : i32
    %c0_i32_1 = arith.constant 0 : i32
    return %c0_i32, %c0_i32_0 : i32, i32
  }
  func.func @transform_4(%arg0: i32) -> (i32, i32) {
    %c0_i32 = arith.constant 0 : i32
    %c0_i32_0 = arith.constant 0 : i32
    %c0_i32_1 = arith.constant 0 : i32
    return %c0_i32, %c0_i32_0 : i32, i32
  }
  func.func @transform_5(%arg0: i32) -> (i32, i32) {
    %c0_i32 = arith.constant 0 : i32
    %c0_i32_0 = arith.constant 0 : i32
    return %arg0, %c0_i32 : i32, i32
  }
}

module attributes {stable_mosaic.version = 11 : i64} {
  func.func @linearized_mlp_kernel(%arg0: i32, %arg1: memref<2x1024xf32, #tpu.memory_space<vmem>>, %arg2: memref<1024x256xf32, #tpu.memory_space<vmem>>, %arg3: memref<1x256xf32, #tpu.memory_space<vmem>>, %arg4: memref<256x128xf32, #tpu.memory_space<vmem>>, %arg5: memref<1x128xf32, #tpu.memory_space<vmem>>, %arg6: memref<2x128xf32, #tpu.memory_space<vmem>>) attributes {dimension_semantics = [#tpu.dimension_semantics<parallel>], iteration_bounds = array<i64: 1>, scalar_prefetch = 0 : i64, scratch_operands = 0 : i64, tpu.core_type = #tpu.core_type<tc>, window_params = [{transform_indices = @transform_0, window_bounds = array<i64: 2, 1024>}, {pipeline_mode = #tpu.pipeline_mode<synchronous>, transform_indices = @transform_1, window_bounds = array<i64: 1024, 256>}, {pipeline_mode = #tpu.pipeline_mode<synchronous>, transform_indices = @transform_2, window_bounds = array<i64: 1, 256>}, {pipeline_mode = #tpu.pipeline_mode<synchronous>, transform_indices = @transform_3, window_bounds = array<i64: 256, 128>}, {pipeline_mode = #tpu.pipeline_mode<synchronous>, transform_indices = @transform_4, window_bounds = array<i64: 1, 128>}, {transform_indices = @transform_5, window_bounds = array<i64: 2, 128>}]} {
    %c0 = arith.constant 0 : index
    %c0_0 = arith.constant 0 : index
    %0 = vector.load %arg1[%c0, %c0_0] : memref<2x1024xf32, #tpu.memory_space<vmem>>, vector<2x1024xf32>
    %c0_1 = arith.constant 0 : index
    %c0_2 = arith.constant 0 : index
    %1 = vector.load %arg2[%c0_1, %c0_2] : memref<1024x256xf32, #tpu.memory_space<vmem>>, vector<1024x256xf32>
    %cst = arith.constant dense<0.000000e+00> : vector<2x256xf32>
    %2 = tpu.matmul %0, %1, %cst {dimension_numbers = #tpu.dot_dimension_numbers<[1], [0], [0], [1], [0, 0, 1, 1], [], []>} : vector<2x1024xf32>, vector<1024x256xf32>, vector<2x256xf32> -> vector<2x256xf32>
    %c0_3 = arith.constant 0 : index
    %c0_4 = arith.constant 0 : index
    %3 = vector.load %arg3[%c0_3, %c0_4] : memref<1x256xf32, #tpu.memory_space<vmem>>, vector<1x256xf32>
    %4 = vector.broadcast %3 : vector<1x256xf32> to vector<2x256xf32>
    %5 = arith.addf %2, %4 : vector<2x256xf32>
    %6 = vector.extract_strided_slice %5 {offsets = [0, 0], sizes = [2, 128], strides = [1, 1]} : vector<2x256xf32> to vector<2x128xf32>
    %7 = vector.extract_strided_slice %5 {offsets = [0, 128], sizes = [2, 128], strides = [1, 1]} : vector<2x256xf32> to vector<2x128xf32>
    %8 = math.tanh %6 : vector<2x128xf32>
    %9 = arith.mulf %8, %8 : vector<2x128xf32>
    %cst_5 = arith.constant 1.000000e+00 : f32
    %10 = vector.broadcast %cst_5 : f32 to vector<2x128xf32>
    %11 = arith.subf %10, %9 : vector<2x128xf32>
    %12 = arith.mulf %11, %7 : vector<2x128xf32>
    %13 = tpu.concatenate %12, %8 in 1 : vector<2x128xf32>, vector<2x128xf32> -> vector<2x256xf32>
    %c0_6 = arith.constant 0 : index
    %c0_7 = arith.constant 0 : index
    %14 = vector.load %arg4[%c0_6, %c0_7] : memref<256x128xf32, #tpu.memory_space<vmem>>, vector<256x128xf32>
    %cst_8 = arith.constant dense<0.000000e+00> : vector<2x128xf32>
    %15 = tpu.matmul %13, %14, %cst_8 {dimension_numbers = #tpu.dot_dimension_numbers<[1], [0], [0], [1], [0, 0, 1, 1], [], []>} : vector<2x256xf32>, vector<256x128xf32>, vector<2x128xf32> -> vector<2x128xf32>
    %c0_9 = arith.constant 0 : index
    %c0_10 = arith.constant 0 : index
    %16 = vector.load %arg5[%c0_9, %c0_10] : memref<1x128xf32, #tpu.memory_space<vmem>>, vector<1x128xf32>
    %17 = vector.broadcast %16 : vector<1x128xf32> to vector<2x128xf32>
    %18 = arith.addf %15, %17 : vector<2x128xf32>
    %c0_11 = arith.constant 0 : index
    %c0_12 = arith.constant 0 : index
    %19 = vector.load %arg6[%c0_11, %c0_12] : memref<2x128xf32, #tpu.memory_space<vmem>>, vector<2x128xf32>
    tpu.vector_store %arg6[%c0_11, %c0_12], %18 {strides = array<i32>} : memref<2x128xf32, #tpu.memory_space<vmem>>, vector<2x128xf32>,
    return
  }
  func.func @transform_0(%arg0: i32) -> (i32, i32) {
    %c0_i32 = arith.constant 0 : i32
    %c0_i32_0 = arith.constant 0 : i32
    return %arg0, %c0_i32 : i32, i32
  }
  func.func @transform_1(%arg0: i32) -> (i32, i32) {
    %c0_i32 = arith.constant 0 : i32
    %c0_i32_0 = arith.constant 0 : i32
    %c0_i32_1 = arith.constant 0 : i32
    return %c0_i32, %c0_i32_0 : i32, i32
  }
  func.func @transform_2(%arg0: i32) -> (i32, i32) {
    %c0_i32 = arith.constant 0 : i32
    %c0_i32_0 = arith.constant 0 : i32
    %c0_i32_1 = arith.constant 0 : i32
    return %c0_i32, %c0_i32_0 : i32, i32
  }
  func.func @transform_3(%arg0: i32) -> (i32, i32) {
    %c0_i32 = arith.constant 0 : i32
    %c0_i32_0 = arith.constant 0 : i32
    %c0_i32_1 = arith.constant 0 : i32
    return %c0_i32, %c0_i32_0 : i32, i32
  }
  func.func @transform_4(%arg0: i32) -> (i32, i32) {
    %c0_i32 = arith.constant 0 : i32
    %c0_i32_0 = arith.constant 0 : i32
    %c0_i32_1 = arith.constant 0 : i32
    return %c0_i32, %c0_i32_0 : i32, i32
  }
  func.func @transform_5(%arg0: i32) -> (i32, i32) {
    %c0_i32 = arith.constant 0 : i32
    %c0_i32_0 = arith.constant 0 : i32
    return %arg0, %c0_i32 : i32, i32
  }
}

</mosaic_0001>

<bundles_post_ra>
// kernel: tpu_custom_call.1
= control target key start
LH: loop header
LB: loop body
LE: loop exit
PB: predicated region body
PF: predicated region fallthrough
CT: control target
= control target key end

     0   :  { %10 = vsyncpa [#allocation3], 0  ;;  %s1361_s0 = inlined_call_operand.hbm [shape: f32[2,1024], index: 0, kind: input, shape index: {}]   ;;  %s1362_s1 = inlined_call_operand.hbm [shape: f32[1024,256], index: 1, kind: input, shape index: {}]   ;;  %s1363_s2 = inlined_call_operand.vmem [shape: f32[1,256], index: 2, kind: input, shape index: {}]   ;;  %s1364_s3 = inlined_call_operand.hbm [shape: f32[256,128], index: 3, kind: input, shape index: {}]   ;;  %s1365_s4 = inlined_call_operand.vmem [shape: f32[1,128], index: 4, kind: input, shape index: {}]   ;;  %s1366_s5 = inlined_call_operand.hbm [shape: f32[2,128], index: 5, kind: output, shape index: {}]  }
   0x1   :  { %11 = vsyncpa [#allocation6], 0 }
   0x2   :  { %12 = vsyncpa [#allocation4], 0  ;;  %s1227_s18 = smov [#allocation5]   ;;  %s1133_s22 = scalar_lea.hbm %s1362_s1, 32768 }
   0x3   :  { %s28_s19 = sshll.u32 %s1227_s18, 4  ;;  %p1134_p0 = scmp.ne.s32.totalorder %s1362_s1, %s1133_s22  ;;  %s29_s19 = int_to_ptr.vmem [resolvable:$true] %s28_s19 }
   0x4   :  { %p1137_p1 = scmp.lt.u32.totalorder %s1133_s22, %s1362_s1 }
   0x6   :  { %p1139_p2 = pnand %p1137_p1, %p1134_p0 }
   0x8   :  { %1142 = shalt.err (!%p1139_p2)
}
   0x9   :  { %s1143_s27 = scalar_lea.vmem %s29_s19, 32768  ;;  %p1148_p4 = scmp.lt.s32.totalorder %s29_s19, %s29_s19 }
   0xa   :  { %p1144_p3 = scmp.ne.s32.totalorder %s29_s19, %s1143_s27  ;;  %p1149_p5 = scmp.lt.s32.totalorder %s1143_s27, %s1143_s27 }
   0xc   :  { %p1150_p6 = por %p1149_p5, %p1148_p4 }
   0xe   :  { %p1151_p7 = pnand %p1150_p6, %p1144_p3 }
  0x10   :  { %1154 = shalt.err (!%p1151_p7)
}
  0x11   :  { %s1228_s28 = smov 256   ;;  %s1229_s29 = smov 16  }
  0x12   :  { %34 = dma.hbm_to_vmem [thread:$0]  %s1362_s1, 32768, %s29_s19, [#allocation6], %s1228_s28, %s1228_s28, %s1229_s29  }
  0x13   :  { %s1230_s7 = smov [#allocation2]   ;;  %s1231_s9 = smov [#allocation7]  }
  0x14   :  { %s19_s8 = sshll.u32 %s1230_s7, 4  ;;  %s42_s10 = sshll.u32 %s1231_s9, 4  ;;  %s20_s8 = int_to_ptr.vmem [resolvable:$true] %s19_s8  ;;  %s43_s10 = int_to_ptr.vmem [resolvable:$true] %s42_s10 }
  0x15   :  { %s1155_s13 = scalar_lea.hbm %s1361_s0, 256 }
  0x16   :  { %p1156_p8 = scmp.ne.s32.totalorder %s1361_s0, %s1155_s13  ;;  %p1159_p9 = scmp.lt.u32.totalorder %s1155_s13, %s1361_s0 }
  0x18   :  { %p1161_p10 = pnand %p1159_p9, %p1156_p8 }
  0x1a   :  { %1164 = shalt.err (!%p1161_p10)
}
  0x1b   :  { %s1165_s1 = scalar_lea.vmem %s20_s8, 256  ;;  %p1170_p12 = scmp.lt.s32.totalorder %s20_s8, %s20_s8 }
  0x1c   :  { %p1166_p11 = scmp.ne.s32.totalorder %s20_s8, %s1165_s1  ;;  %p1171_p13 = scmp.lt.s32.totalorder %s1165_s1, %s1165_s1 }
  0x1e   :  { %p1172_p0 = por %p1171_p13, %p1170_p12 }
  0x20   :  { %p1173_p1 = pnand %p1172_p0, %p1166_p11 }
  0x22   :  { %1176 = shalt.err (!%p1173_p1)
}
  0x23   :  { %22 = dma.hbm_to_vmem [thread:$0]  %s1361_s0, 256, %s20_s8, [#allocation3]  }
  0x24   :  { %s1177_s22 = scalar_lea.hbm %s1364_s3, 4096 }
  0x25   :  { %p1178_p2 = scmp.ne.s32.totalorder %s1364_s3, %s1177_s22  ;;  %p1181_p3 = scmp.lt.u32.totalorder %s1177_s22, %s1364_s3 }
  0x27   :  { %p1183_p4 = pnand %p1181_p3, %p1178_p2 }
  0x29   :  { %1186 = shalt.err (!%p1183_p4)
}
  0x2a   :  { %s1187_s27 = scalar_lea.vmem %s43_s10, 4096  ;;  %p1192_p6 = scmp.lt.s32.totalorder %s43_s10, %s43_s10 }
  0x2b   :  { %p1188_p5 = scmp.ne.s32.totalorder %s43_s10, %s1187_s27  ;;  %p1193_p7 = scmp.lt.s32.totalorder %s1187_s27, %s1187_s27 }
  0x2d   :  { %p1194_p8 = por %p1193_p7, %p1192_p6 }
  0x2f   :  { %p1195_p9 = pnand %p1194_p8, %p1188_p5 }
  0x31   :  { %1198 = shalt.err (!%p1195_p9)
}
  0x32   :  { %s1232_s0 = smov 128   ;;  %s1233_s28 = smov 8  }
  0x33   :  { %48 = dma.hbm_to_vmem [thread:$0]  %s1364_s3, 4096, %s43_s10, [#allocation6], %s1232_s0, %s1232_s0, %s1233_s28  }
  0x34   :  { %1221 = dma.done.wait [#allocation3], 256  }
  0x35   :  { %1222 = vsyncadd [#allocation3], 4294967040 }
  0x36   :  { %1223 = dma.done.wait [#allocation6], 36864  }
  0x37   :  { %1224 = vsyncadd [#allocation6], 4294930432  ;;  %v63_v0 = vld [vmem:[#allocation5 + $0x8] sm:$0xff]  ;;  %v65_v1 = vld [vmem:[#allocation5 + $0x18] sm:$0xff]  ;;  %s1235_s8 = smov [#allocation8]  }
  0x38   :  { %v191_v2 = vld [vmem:[#allocation5 + $0x408] sm:$0xff]  ;;  %v824_v3 = vpack.c.bf16 %v65_v1, %v63_v0  ;;  %v193_v4 = vld [vmem:[#allocation5 + $0x418] sm:$0xff]  ;;  %v62_v5 = vld [vmem:[#allocation5] sm:$0xff]  ;;  %s778_s9 = sshll.u32 %s1235_s8, 4  ;;  %s779_s9 = int_to_ptr.vmem [resolvable:$true] %s778_s9 }
  0x39   :  { %v64_v6 = vld [vmem:[#allocation5 + $0x10] sm:$0xff]  ;;  %v952_v7 = vpack.c.bf16 %v193_v4, %v191_v2  ;;  %v190_v9 = vld [vmem:[#allocation5 + $0x400] sm:$0xff]  ;;  %v67_v11 = vld [vmem:[#allocation5 + $0x28] sm:$0xff]  ;;  %s1199_s10 = scalar_lea.vmem %s779_s9, 32  ;;  %p1204_p11 = scmp.lt.s32.totalorder %s779_s9, %s779_s9 }
  0x3a   :  { %v826_v8 = vpack.c.bf16 %v64_v6, %v62_v5  ;;  %v192_v10 = vld [vmem:[#allocation5 + $0x410] sm:$0xff]  ;;  %825 = vmatprep.subr.bf16.mxu1 %v824_v3  ;;  %v69_v13 = vld [vmem:[#allocation5 + $0x38] sm:$0xff]  ;;  %v195_v14 = vld [vmem:[#allocation5 + $0x428] sm:$0xff]  ;;  %p1200_p10 = scmp.ne.s32.totalorder %s779_s9, %s1199_s10  ;;  %p1205_p12 = scmp.lt.s32.totalorder %s1199_s10, %s1199_s10 }
  0x3b   :  { %v954_v12 = vpack.c.bf16 %v192_v10, %v190_v9  ;;  %v197_v15 = vld [vmem:[#allocation5 + $0x438] sm:$0xff]  ;;  %953 = vmatprep.subr.bf16.mxu0 %v952_v7  ;;  %v828_v16 = vpack.c.bf16 %v69_v13, %v67_v11  ;;  %v66_v18 = vld [vmem:[#allocation5 + $0x20] sm:$0xff]  ;;  %v68_v19 = vld [vmem:[#allocation5 + $0x30] sm:$0xff] }
  0x3c   :  { %827 = vmatpush1.bf16.msra.mxu1 %v826_v8  ;;  %v956_v17 = vpack.c.bf16 %v197_v15, %v195_v14  ;;  %v194_v20 = vld [vmem:[#allocation5 + $0x420] sm:$0xff]  ;;  %v830_v21 = vpack.c.bf16 %v68_v19, %v66_v18  ;;  %v196_v22 = vld [vmem:[#allocation5 + $0x430] sm:$0xff]  ;;  %v71_v23 = vld [vmem:[#allocation5 + $0x48] sm:$0xff]  ;;  %p1206_p13 = por %p1205_p12, %p1204_p11 }
  0x3d   :  { %955 = vmatpush1.bf16.msra.mxu0 %v954_v12  ;;  %v73_v24 = vld [vmem:[#allocation5 + $0x58] sm:$0xff]  ;;  %829 = vmatprep.subr.bf16.mxu1 %v828_v16  ;;  %v958_v25 = vpack.c.bf16 %v196_v22, %v194_v20  ;;  %v199_v27 = vld [vmem:[#allocation5 + $0x448] sm:$0xff]  ;;  %v70_v29 = vld [vmem:[#allocation5 + $0x40] sm:$0xff] }
  0x3e   :  { %957 = vmatprep.subr.bf16.mxu0 %v956_v17  ;;  %v832_v26 = vpack.c.bf16 %v73_v24, %v71_v23  ;;  %v201_v28 = vld [vmem:[#allocation5 + $0x458] sm:$0xff]  ;;  %v72_v31 = vld [vmem:[#allocation5 + $0x50] sm:$0xff]  ;;  %v198_v32 = vld [vmem:[#allocation5 + $0x440] sm:$0xff]  ;;  %p1207_p0 = pnand %p1206_p13, %p1200_p10 }
  0x3f   :  { %v960_v30 = vpack.c.bf16 %v201_v28, %v199_v27  ;;  %v200_v33 = vld [vmem:[#allocation5 + $0x450] sm:$0xff]  ;;  %v834_v34 = vpack.c.bf16 %v72_v31, %v70_v29  ;;  %v75_v35 = vld [vmem:[#allocation5 + $0x68] sm:$0xff]  ;;  %v77_v36 = vld [vmem:[#allocation5 + $0x78] sm:$0xff] }
  0x40   :  { %831 = vmatpush1.bf16.msra.mxu1 %v830_v21  ;;  %v203_v37 = vld [vmem:[#allocation5 + $0x468] sm:$0xff]  ;;  %v962_v38 = vpack.c.bf16 %v200_v33, %v198_v32  ;;  %v836_v39 = vpack.c.bf16 %v77_v36, %v75_v35  ;;  %v205_v40 = vld [vmem:[#allocation5 + $0x478] sm:$0xff]  ;;  %v74_v41 = vld [vmem:[#allocation5 + $0x60] sm:$0xff] }
  0x41   :  { %959 = vmatpush1.bf16.msra.mxu0 %v958_v25  ;;  %833 = vmatprep.subr.bf16.mxu1 %v832_v26  ;;  %v76_v42 = vld [vmem:[#allocation5 + $0x70] sm:$0xff]  ;;  %v964_v43 = vpack.c.bf16 %v205_v40, %v203_v37  ;;  %v202_v44 = vld [vmem:[#allocation5 + $0x460] sm:$0xff]  ;;  %v79_v46 = vld [vmem:[#allocation5 + $0x88] sm:$0xff] }
  0x42   :  { %961 = vmatprep.subr.bf16.mxu0 %v960_v30  ;;  %v204_v45 = vld [vmem:[#allocation5 + $0x470] sm:$0xff]  ;;  %v81_v47 = vld [vmem:[#allocation5 + $0x98] sm:$0xff]  ;;  %v207_v48 = vld [vmem:[#allocation5 + $0x488] sm:$0xff]  ;;  %v838_v50 = vpack.c.bf16 %v76_v42, %v74_v41 }
  0x43   :  { %v209_v49 = vld [vmem:[#allocation5 + $0x498] sm:$0xff]  ;;  %v966_v51 = vpack.c.bf16 %v204_v45, %v202_v44  ;;  %v840_v52 = vpack.c.bf16 %v81_v47, %v79_v46  ;;  %v78_v53 = vld [vmem:[#allocation5 + $0x80] sm:$0xff]  ;;  %v80_v54 = vld [vmem:[#allocation5 + $0x90] sm:$0xff]  ;;  %v320_v46 = vlaneseq  ;;  %v1234_v47 = vmov 1983009808  }
  0x44   :  { %835 = vmatpush1.bf16.msra.mxu1 %v834_v34  ;;  %v206_v55 = vld [vmem:[#allocation5 + $0x480] sm:$0xff]  ;;  %v968_v56 = vpack.c.bf16 %v209_v49, %v207_v48  ;;  %v208_v57 = vld [vmem:[#allocation5 + $0x490] sm:$0xff]  ;;  %v83_v58 = vld [vmem:[#allocation5 + $0xa8] sm:$0xff]  ;;  %v842_v62 = vpack.c.bf16 %v80_v54, %v78_v53  ;;  %v334_v48 = vunpack.c.l.s4 %v1234_v47 }
  0x45   :  { %963 = vmatpush1.bf16.msra.mxu0 %v962_v38  ;;  %837 = vmatprep.subr.bf16.mxu1 %v836_v39  ;;  %v85_v59 = vld [vmem:[#allocation5 + $0xb8] sm:$0xff]  ;;  %v211_v60 = vld [vmem:[#allocation5 + $0x4a8] sm:$0xff]  ;;  %v970_v63 = vpack.c.bf16 %v208_v57, %v206_v55  ;;  %v82_v1 = vld [vmem:[#allocation5 + $0xa0] sm:$0xff] }
  0x46   :  { %965 = vmatprep.subr.bf16.mxu0 %v964_v43  ;;  %v213_v61 = vld [vmem:[#allocation5 + $0x4b8] sm:$0xff]  ;;  %v844_v0 = vpack.c.bf16 %v85_v59, %v83_v58  ;;  %v84_v2 = vld [vmem:[#allocation5 + $0xb0] sm:$0xff]  ;;  %v210_v3 = vld [vmem:[#allocation5 + $0x4a0] sm:$0xff] }
  0x47   :  { %v972_v4 = vpack.c.bf16 %v213_v61, %v211_v60  ;;  %v212_v5 = vld [vmem:[#allocation5 + $0x4b0] sm:$0xff]  ;;  %v87_v6 = vld [vmem:[#allocation5 + $0xc8] sm:$0xff]  ;;  %v89_v7 = vld [vmem:[#allocation5 + $0xd8] sm:$0xff]  ;;  %v846_v10 = vpack.c.bf16 %v84_v2, %v82_v1  ;;  %v1302_v61 = vshrl.u32 %v320_v46, 7 }
  0x48   :  { %839 = vmatpush1.bf16.msra.mxu1 %v838_v50  ;;  %v215_v8 = vld [vmem:[#allocation5 + $0x4c8] sm:$0xff]  ;;  %v217_v9 = vld [vmem:[#allocation5 + $0x4d8] sm:$0xff]  ;;  %v974_v11 = vpack.c.bf16 %v212_v5, %v210_v3  ;;  %v848_v12 = vpack.c.bf16 %v89_v7, %v87_v6  ;;  %v86_v13 = vld [vmem:[#allocation5 + $0xc0] sm:$0xff] }
  0x49   :  { %967 = vmatpush1.bf16.msra.mxu0 %v966_v51  ;;  %841 = vmatprep.subr.bf16.mxu1 %v840_v52  ;;  %v88_v14 = vld [vmem:[#allocation5 + $0xd0] sm:$0xff]  ;;  %v214_v15 = vld [vmem:[#allocation5 + $0x4c0] sm:$0xff]  ;;  %v976_v16 = vpack.c.bf16 %v217_v9, %v215_v8  ;;  %v91_v18 = vld [vmem:[#allocation5 + $0xe8] sm:$0xff] }
  0x4a   :  { %969 = vmatprep.subr.bf16.mxu0 %v968_v56  ;;  %v216_v17 = vld [vmem:[#allocation5 + $0x4d0] sm:$0xff]  ;;  %v93_v19 = vld [vmem:[#allocation5 + $0xf8] sm:$0xff]  ;;  %v219_v20 = vld [vmem:[#allocation5 + $0x4e8] sm:$0xff]  ;;  %v850_v22 = vpack.c.bf16 %v88_v14, %v86_v13 }
  0x4b   :  { %v221_v21 = vld [vmem:[#allocation5 + $0x4f8] sm:$0xff]  ;;  %v978_v23 = vpack.c.bf16 %v216_v17, %v214_v15  ;;  %v852_v24 = vpack.c.bf16 %v93_v19, %v91_v18  ;;  %v90_v25 = vld [vmem:[#allocation5 + $0xe0] sm:$0xff]  ;;  %v92_v26 = vld [vmem:[#allocation5 + $0xf0] sm:$0xff] }
  0x4c   :  { %843 = vmatpush1.bf16.msra.mxu1 %v842_v62  ;;  %v218_v27 = vld [vmem:[#allocation5 + $0x4e0] sm:$0xff]  ;;  %v980_v28 = vpack.c.bf16 %v221_v21, %v219_v20  ;;  %v220_v29 = vld [vmem:[#allocation5 + $0x4f0] sm:$0xff]  ;;  %v95_v30 = vld [vmem:[#allocation5 + $0x108] sm:$0xff]  ;;  %v854_v34 = vpack.c.bf16 %v92_v26, %v90_v25  ;;  %v335_v62 = vunpack.c.0.s8 %v334_v48 }
  0x4d   :  { %971 = vmatpush1.bf16.msra.mxu0 %v970_v63  ;;  %845 = vmatprep.subr.bf16.mxu1 %v844_v0  ;;  %v97_v31 = vld [vmem:[#allocation5 + $0x118] sm:$0xff]  ;;  %v223_v32 = vld [vmem:[#allocation5 + $0x508] sm:$0xff]  ;;  %v982_v35 = vpack.c.bf16 %v220_v29, %v218_v27  ;;  %v94_v37 = vld [vmem:[#allocation5 + $0x100] sm:$0xff] }
  0x4e   :  { %973 = vmatprep.subr.bf16.mxu0 %v972_v4  ;;  %v225_v33 = vld [vmem:[#allocation5 + $0x518] sm:$0xff]  ;;  %v856_v36 = vpack.c.bf16 %v97_v31, %v95_v30  ;;  %v96_v38 = vld [vmem:[#allocation5 + $0x110] sm:$0xff]  ;;  %v222_v39 = vld [vmem:[#allocation5 + $0x500] sm:$0xff] }
  0x4f   :  { %v984_v40 = vpack.c.bf16 %v225_v33, %v223_v32  ;;  %v224_v41 = vld [vmem:[#allocation5 + $0x510] sm:$0xff]  ;;  %v99_v42 = vld [vmem:[#allocation5 + $0x128] sm:$0xff]  ;;  %v101_v43 = vld [vmem:[#allocation5 + $0x138] sm:$0xff]  ;;  %v858_v49 = vpack.c.bf16 %v96_v38, %v94_v37 }
  0x50   :  { %847 = vmatpush1.bf16.msra.mxu1 %v846_v10  ;;  %v227_v44 = vld [vmem:[#allocation5 + $0x528] sm:$0xff]  ;;  %v229_v45 = vld [vmem:[#allocation5 + $0x538] sm:$0xff]  ;;  %v986_v50 = vpack.c.bf16 %v224_v41, %v222_v39  ;;  %v860_v51 = vpack.c.bf16 %v101_v43, %v99_v42  ;;  %v98_v52 = vld [vmem:[#allocation5 + $0x120] sm:$0xff] }
  0x51   :  { %975 = vmatpush1.bf16.msra.mxu0 %v974_v11  ;;  %849 = vmatprep.subr.bf16.mxu1 %v848_v12  ;;  %v100_v53 = vld [vmem:[#allocation5 + $0x130] sm:$0xff]  ;;  %v226_v54 = vld [vmem:[#allocation5 + $0x520] sm:$0xff]  ;;  %v988_v55 = vpack.c.bf16 %v229_v45, %v227_v44  ;;  %v103_v57 = vld [vmem:[#allocation5 + $0x148] sm:$0xff]  ;;  %v1305_v11 = vsub.s32 %v335_v62, %v1302_v61 }
  0x52   :  { %977 = vmatprep.subr.bf16.mxu0 %v976_v16  ;;  %v228_v56 = vld [vmem:[#allocation5 + $0x530] sm:$0xff]  ;;  %v105_v58 = vld [vmem:[#allocation5 + $0x158] sm:$0xff]  ;;  %v231_v59 = vld [vmem:[#allocation5 + $0x548] sm:$0xff]  ;;  %v862_v63 = vpack.c.bf16 %v100_v53, %v98_v52 }
  0x53   :  { %v233_v60 = vld [vmem:[#allocation5 + $0x558] sm:$0xff]  ;;  %v990_v0 = vpack.c.bf16 %v228_v56, %v226_v54  ;;  %v864_v1 = vpack.c.bf16 %v105_v58, %v103_v57  ;;  %v102_v2 = vld [vmem:[#allocation5 + $0x140] sm:$0xff]  ;;  %v104_v3 = vld [vmem:[#allocation5 + $0x150] sm:$0xff] }
  0x54   :  { %851 = vmatpush1.bf16.msra.mxu1 %v850_v22  ;;  %v230_v4 = vld [vmem:[#allocation5 + $0x540] sm:$0xff]  ;;  %v992_v5 = vpack.c.bf16 %v233_v60, %v231_v59  ;;  %v232_v6 = vld [vmem:[#allocation5 + $0x550] sm:$0xff]  ;;  %v107_v7 = vld [vmem:[#allocation5 + $0x168] sm:$0xff]  ;;  %v866_v12 = vpack.c.bf16 %v104_v3, %v102_v2 }
  0x55   :  { %979 = vmatpush1.bf16.msra.mxu0 %v978_v23  ;;  %853 = vmatprep.subr.bf16.mxu1 %v852_v24  ;;  %v109_v8 = vld [vmem:[#allocation5 + $0x178] sm:$0xff]  ;;  %v235_v9 = vld [vmem:[#allocation5 + $0x568] sm:$0xff]  ;;  %v106_v13 = vld [vmem:[#allocation5 + $0x160] sm:$0xff]  ;;  %v994_v14 = vpack.c.bf16 %v232_v6, %v230_v4 }
  0x56   :  { %981 = vmatprep.subr.bf16.mxu0 %v980_v28  ;;  %v237_v10 = vld [vmem:[#allocation5 + $0x578] sm:$0xff]  ;;  %v868_v15 = vpack.c.bf16 %v109_v8, %v107_v7  ;;  %v108_v16 = vld [vmem:[#allocation5 + $0x170] sm:$0xff]  ;;  %v234_v17 = vld [vmem:[#allocation5 + $0x560] sm:$0xff] }
  0x57   :  { %v236_v18 = vld [vmem:[#allocation5 + $0x570] sm:$0xff]  ;;  %v996_v19 = vpack.c.bf16 %v237_v10, %v235_v9  ;;  %v111_v20 = vld [vmem:[#allocation5 + $0x188] sm:$0xff]  ;;  %v113_v21 = vld [vmem:[#allocation5 + $0x198] sm:$0xff]  ;;  %v870_v27 = vpack.c.bf16 %v108_v16, %v106_v13 }
  0x58   :  { %855 = vmatpush1.bf16.msra.mxu1 %v854_v34  ;;  %v1307_v22 = vld [vmem:[#allocation2] sm:$0xff]  ;;  %v239_v23 = vld [vmem:[#allocation5 + $0x588] sm:$0xff]  ;;  %v241_v24 = vld [vmem:[#allocation5 + $0x598] sm:$0xff]  ;;  %v998_v29 = vpack.c.bf16 %v236_v18, %v234_v17  ;;  %v872_v30 = vpack.c.bf16 %v113_v21, %v111_v20 }
  0x59   :  { %983 = vmatpush1.bf16.msra.mxu0 %v982_v35  ;;  %857 = vmatprep.subr.bf16.mxu1 %v856_v36  ;;  %v1311_v25 = vrot.slane %v1307_v22, %v1305_v11  ;;  %v1313_v26 = vld [vmem:[#allocation2 + $0x8] sm:$0xff]  ;;  %v110_v31 = vld [vmem:[#allocation5 + $0x180] sm:$0xff]  ;;  %v112_v32 = vld [vmem:[#allocation5 + $0x190] sm:$0xff]  ;;  %v1000_v35 = vpack.c.bf16 %v241_v24, %v239_v23 }
  0x5a   :  { %985 = vmatprep.subr.bf16.mxu0 %v984_v40  ;;  %v1317_v28 = vrot.slane %v1313_v26, %v1305_v11  ;;  %v238_v33 = vld [vmem:[#allocation5 + $0x580] sm:$0xff]  ;;  %v240_v36 = vld [vmem:[#allocation5 + $0x590] sm:$0xff]  ;;  %v115_v37 = vld [vmem:[#allocation5 + $0x1a8] sm:$0xff]  ;;  %v874_v42 = vpack.c.bf16 %v112_v32, %v110_v31 }
  0x5b   :  { %v347_v34 = vcombine.high %v1311_v25, %v1311_v25  ;;  %v117_v38 = vld [vmem:[#allocation5 + $0x1b8] sm:$0xff]  ;;  %v243_v40 = vld [vmem:[#allocation5 + $0x5a8] sm:$0xff]  ;;  %v1002_v43 = vpack.c.bf16 %v240_v36, %v238_v33  ;;  %v114_v45 = vld [vmem:[#allocation5 + $0x1a0] sm:$0xff] }
  0x5c   :  { %859 = vmatpush1.bf16.msra.mxu1 %v858_v49  ;;  %v364_v39 = vcombine.high %v1317_v28, %v1317_v28  ;;  %v245_v41 = vld [vmem:[#allocation5 + $0x5b8] sm:$0xff]  ;;  %v876_v44 = vpack.c.bf16 %v117_v38, %v115_v37  ;;  %v116_v46 = vld [vmem:[#allocation5 + $0x1b0] sm:$0xff]  ;;  %v242_v47 = vld [vmem:[#allocation5 + $0x5a0] sm:$0xff] }
  0x5d   :  { %987 = vmatpush1.bf16.msra.mxu0 %v986_v50  ;;  %861 = vmatprep.subr.bf16.mxu1 %v860_v51  ;;  %v1004_v48 = vpack.c.bf16 %v245_v41, %v243_v40  ;;  %v244_v49 = vld [vmem:[#allocation5 + $0x5b0] sm:$0xff]  ;;  %v119_v50 = vld [vmem:[#allocation5 + $0x1c8] sm:$0xff]  ;;  %v121_v51 = vld [vmem:[#allocation5 + $0x1d8] sm:$0xff]  ;;  %v878_v54 = vpack.c.bf16 %v116_v46, %v114_v45 }
  0x5e   :  { %989 = vmatprep.subr.bf16.mxu0 %v988_v55  ;;  %438 = vmatprep.mubr.f32.mxu1 %v347_v34  ;;  %v247_v52 = vld [vmem:[#allocation5 + $0x5c8] sm:$0xff]  ;;  %v249_v53 = vld [vmem:[#allocation5 + $0x5d8] sm:$0xff]  ;;  %v1006_v55 = vpack.c.bf16 %v244_v49, %v242_v47  ;;  %v880_v56 = vpack.c.bf16 %v121_v51, %v119_v50  ;;  %v118_v57 = vld [vmem:[#allocation5 + $0x1c0] sm:$0xff] }
  0x5f   :  { %580 = vmatprep.mubr.f32.mxu0 %v364_v39  ;;  %v120_v58 = vld [vmem:[#allocation5 + $0x1d0] sm:$0xff]  ;;  %v246_v59 = vld [vmem:[#allocation5 + $0x5c0] sm:$0xff]  ;;  %v1008_v60 = vpack.c.bf16 %v249_v53, %v247_v52  ;;  %v253_v2 = vld [vmem:[#allocation5 + $0x5f8] sm:$0xff] }
  0x60   :  { %863 = vmatpush1.bf16.msra.mxu1 %v862_v63  ;;  %v248_v62 = vld [vmem:[#allocation5 + $0x5d0] sm:$0xff]  ;;  %v123_v63 = vld [vmem:[#allocation5 + $0x1e8] sm:$0xff]  ;;  %v882_v3 = vpack.c.bf16 %v120_v58, %v118_v57  ;;  %v122_v6 = vld [vmem:[#allocation5 + $0x1e0] sm:$0xff] }
  0x61   :  { %991 = vmatpush1.bf16.msra.mxu0 %v990_v0  ;;  %865 = vmatprep.subr.bf16.mxu1 %v864_v1  ;;  %v125_v0 = vld [vmem:[#allocation5 + $0x1f8] sm:$0xff]  ;;  %v251_v1 = vld [vmem:[#allocation5 + $0x5e8] sm:$0xff]  ;;  %v1010_v4 = vpack.c.bf16 %v248_v62, %v246_v59  ;;  %v124_v7 = vld [vmem:[#allocation5 + $0x1f0] sm:$0xff] }
  0x62   :  { %993 = vmatprep.subr.bf16.mxu0 %v992_v5  ;;  %v884_v5 = vpack.c.bf16 %v125_v0, %v123_v63  ;;  %v250_v8 = vld [vmem:[#allocation5 + $0x5e0] sm:$0xff]  ;;  %v1012_v9 = vpack.c.bf16 %v253_v2, %v251_v1  ;;  %v252_v10 = vld [vmem:[#allocation5 + $0x5f0] sm:$0xff]  ;;  %v127_v13 = vld [vmem:[#allocation5 + $0x208] sm:$0xff]  ;;  %v886_v18 = vpack.c.bf16 %v124_v7, %v122_v6 }
  0x63   :  { %v255_v16 = vld [vmem:[#allocation5 + $0x608] sm:$0xff]  ;;  %v257_v17 = vld [vmem:[#allocation5 + $0x618] sm:$0xff]  ;;  %v126_v21 = vld [vmem:[#allocation5 + $0x200] sm:$0xff] }
  0x64   :  { %867 = vmatpush1.bf16.msra.mxu1 %v866_v12  ;;  %v332_v12 = vcombine.high %v1307_v22, %v1307_v22  ;;  %v128_v23 = vld [vmem:[#allocation5 + $0x210] sm:$0xff]  ;;  %v254_v24 = vld [vmem:[#allocation5 + $0x600] sm:$0xff]  ;;  %v131_v22 = vld [vmem:[#allocation5 + $0x228] sm:$0xff] }
  0x65   :  { %995 = vmatpush1.bf16.msra.mxu0 %v994_v14  ;;  %869 = vmatprep.subr.bf16.mxu1 %v868_v15  ;;  %v129_v14 = vld [vmem:[#allocation5 + $0x218] sm:$0xff]  ;;  %v349_v15 = vcombine.high %v1313_v26, %v1313_v26  ;;  %v259_v26 = vld [vmem:[#allocation5 + $0x628] sm:$0xff]  ;;  %v890_v34 = vpack.c.bf16 %v128_v23, %v126_v21  ;;  %v130_v37 = vld [vmem:[#allocation5 + $0x220] sm:$0xff] }
  0x66   :  { %997 = vmatprep.subr.bf16.mxu0 %v996_v19  ;;  %v1014_v19 = vpack.c.bf16 %v252_v10, %v250_v8  ;;  %v888_v20 = vpack.c.bf16 %v129_v14, %v127_v13  ;;  %v1328_v31 = vrot.slane %v332_v12, %v1305_v11  ;;  %v261_v32 = vld [vmem:[#allocation5 + $0x638] sm:$0xff]  ;;  %v132_v38 = vld [vmem:[#allocation5 + $0x230] sm:$0xff]  ;;  %v258_v39 = vld [vmem:[#allocation5 + $0x620] sm:$0xff] }
  0x67   :  { %v1331_v33 = vrot.slane %v349_v15, %v1305_v11  ;;  %v1020_v40 = vpack.c.bf16 %v261_v32, %v259_v26  ;;  %v260_v41 = vld [vmem:[#allocation5 + $0x630] sm:$0xff]  ;;  %v263_v11 = vld [vmem:[#allocation5 + $0x648] sm:$0xff]  ;;  %v265_v45 = vld [vmem:[#allocation5 + $0x658] sm:$0xff]  ;;  %v894_v47 = vpack.c.bf16 %v132_v38, %v130_v37 }
  0x68   :  { %871 = vmatpush1.bf16.msra.mxu1 %v870_v27  ;;  %v1016_v27 = vpack.c.bf16 %v257_v17, %v255_v16  ;;  %v134_v50 = vld [vmem:[#allocation5 + $0x240] sm:$0xff]  ;;  %v136_v51 = vld [vmem:[#allocation5 + $0x250] sm:$0xff]  ;;  %v1024_v53 = vpack.c.bf16 %v265_v45, %v263_v11  ;;  %v269_v57 = vld [vmem:[#allocation5 + $0x678] sm:$0xff] }
  0x69   :  { %999 = vmatpush1.bf16.msra.mxu0 %v998_v29  ;;  %873 = vmatprep.subr.bf16.mxu1 %v872_v30  ;;  %v256_v29 = vld [vmem:[#allocation5 + $0x610] sm:$0xff]  ;;  %v133_v30 = vld [vmem:[#allocation5 + $0x238] sm:$0xff]  ;;  %v365_v46 = vcombine.high %v1331_v33, %v1331_v33  ;;  %v262_v52 = vld [vmem:[#allocation5 + $0x640] sm:$0xff]  ;;  %v898_v58 = vpack.c.bf16 %v136_v51, %v134_v50 }
  0x6a   :  { %1001 = vmatprep.subr.bf16.mxu0 %v1000_v35  ;;  %v1018_v35 = vpack.c.bf16 %v256_v29, %v254_v24  ;;  %v892_v36 = vpack.c.bf16 %v133_v30, %v131_v22  ;;  %v140_v62 = vld [vmem:[#allocation5 + $0x270] sm:$0xff]  ;;  %v266_v63 = vld [vmem:[#allocation5 + $0x660] sm:$0xff]  ;;  %v143_v2 = vld [vmem:[#allocation5 + $0x288] sm:$0xff] }
  0x6b   :  { %v268_v1 = vld [vmem:[#allocation5 + $0x670] sm:$0xff]  ;;  %v270_v12 = vld [vmem:[#allocation5 + $0x680] sm:$0xff]  ;;  %v147_v15 = vld [vmem:[#allocation5 + $0x2a8] sm:$0xff] }
  0x6c   :  { %875 = vmatpush1.bf16.msra.mxu1 %v874_v42  ;;  %v135_v42 = vld [vmem:[#allocation5 + $0x248] sm:$0xff]  ;;  %v1030_v7 = vpack.c.bf16 %v268_v1, %v266_v63  ;;  %v144_v10 = vld [vmem:[#allocation5 + $0x290] sm:$0xff]  ;;  %v149_v16 = vld [vmem:[#allocation5 + $0x2b8] sm:$0xff] }
  0x6d   :  { %1003 = vmatpush1.bf16.msra.mxu0 %v1002_v43  ;;  %877 = vmatprep.subr.bf16.mxu1 %v876_v44  ;;  %v137_v43 = vld [vmem:[#allocation5 + $0x258] sm:$0xff]  ;;  %v348_v44 = vcombine.high %v1328_v31, %v1328_v31  ;;  %v272_v14 = vld [vmem:[#allocation5 + $0x690] sm:$0xff]  ;;  %v275_v17 = vld [vmem:[#allocation5 + $0x6a8] sm:$0xff]  ;;  %v908_v21 = vpack.c.bf16 %v149_v16, %v147_v15 }
  0x6e   :  { %1005 = vmatprep.subr.bf16.mxu0 %v1004_v48  ;;  %v1022_v48 = vpack.c.bf16 %v260_v41, %v258_v39  ;;  %v896_v49 = vpack.c.bf16 %v137_v43, %v135_v42  ;;  %v146_v23 = vld [vmem:[#allocation5 + $0x2a0] sm:$0xff]  ;;  %v148_v24 = vld [vmem:[#allocation5 + $0x2b0] sm:$0xff]  ;;  %v151_v30 = vld [vmem:[#allocation5 + $0x2c8] sm:$0xff] }
  0x6f   :  { %v276_v22 = vld [vmem:[#allocation5 + $0x6b0] sm:$0xff]  ;;  %v153_v26 = vld [vmem:[#allocation5 + $0x2d8] sm:$0xff]  ;;  %v279_v32 = vld [vmem:[#allocation5 + $0x6c8] sm:$0xff] }
  0x70   :  { %879 = vmatpush1.bf16.msra.mxu1 %v878_v54  ;;  %v264_v54 = vld [vmem:[#allocation5 + $0x650] sm:$0xff]  ;;  %v912_v37 = vpack.c.bf16 %v153_v26, %v151_v30  ;;  %v150_v38 = vld [vmem:[#allocation5 + $0x2c0] sm:$0xff]  ;;  %v155_v43 = vld [vmem:[#allocation5 + $0x2e8] sm:$0xff] }
  0x71   :  { %1007 = vmatpush1.bf16.msra.mxu0 %v1006_v55  ;;  %881 = vmatprep.subr.bf16.mxu1 %v880_v56  ;;  %v141_v55 = vld [vmem:[#allocation5 + $0x278] sm:$0xff]  ;;  %v267_v56 = vld [vmem:[#allocation5 + $0x668] sm:$0xff]  ;;  %v152_v39 = vld [vmem:[#allocation5 + $0x2d0] sm:$0xff] }
  0x72   :  { %1009 = vmatprep.subr.bf16.mxu0 %v1008_v60  ;;  %v138_v60 = vld [vmem:[#allocation5 + $0x260] sm:$0xff]  ;;  %v1028_v0 = vpack.c.bf16 %v269_v57, %v267_v56  ;;  %v280_v42 = vld [vmem:[#allocation5 + $0x6d0] sm:$0xff]  ;;  %v283_v11 = vld [vmem:[#allocation5 + $0x6e8] sm:$0xff] }
  0x73   :  { %v902_v6 = vpack.c.bf16 %v140_v62, %v138_v60  ;;  %v285_v45 = vld [vmem:[#allocation5 + $0x6f8] sm:$0xff]  ;;  %v156_v50 = vld [vmem:[#allocation5 + $0x2f0] sm:$0xff]  ;;  %v282_v51 = vld [vmem:[#allocation5 + $0x6e0] sm:$0xff] }
  0x74   :  { %883 = vmatpush1.bf16.msra.mxu1 %v882_v3  ;;  %v145_v3 = vld [vmem:[#allocation5 + $0x298] sm:$0xff]  ;;  %v160_v60 = vld [vmem:[#allocation5 + $0x310] sm:$0xff]  ;;  %v286_v62 = vld [vmem:[#allocation5 + $0x700] sm:$0xff] }
  0x75   :  { %1011 = vmatpush1.bf16.msra.mxu0 %v1010_v4  ;;  %885 = vmatprep.subr.bf16.mxu1 %v884_v5  ;;  %v271_v4 = vld [vmem:[#allocation5 + $0x688] sm:$0xff]  ;;  %v273_v5 = vld [vmem:[#allocation5 + $0x698] sm:$0xff]  ;;  %v904_v8 = vpack.c.bf16 %v145_v3, %v143_v2 }
  0x76   :  { %1013 = vmatprep.subr.bf16.mxu0 %v1012_v9  ;;  %v142_v9 = vld [vmem:[#allocation5 + $0x280] sm:$0xff]  ;;  %v1032_v13 = vpack.c.bf16 %v273_v5, %v271_v4  ;;  %v289_v56 = vld [vmem:[#allocation5 + $0x718] sm:$0xff]  ;;  %v163_v1 = vld [vmem:[#allocation5 + $0x328] sm:$0xff] }
  0x77   :  { %v165_v2 = vld [vmem:[#allocation5 + $0x338] sm:$0xff]  ;;  %v291_v3 = vld [vmem:[#allocation5 + $0x728] sm:$0xff] }
  0x78   :  { %887 = vmatpush1.bf16.msra.mxu1 %v886_v18  ;;  %v277_v18 = vld [vmem:[#allocation5 + $0x6b8] sm:$0xff]  ;;  %v295_v16 = vld [vmem:[#allocation5 + $0x748] sm:$0xff] }
  0x79   :  { %1015 = vmatpush1.bf16.msra.mxu0 %v1014_v19  ;;  %889 = vmatprep.subr.bf16.mxu1 %v888_v20  ;;  %v906_v19 = vpack.c.bf16 %v144_v10, %v142_v9  ;;  %v1034_v20 = vpack.c.bf16 %v272_v14, %v270_v12  ;;  %v1036_v29 = vpack.c.bf16 %v277_v18, %v275_v17  ;;  %v293_v4 = vld [vmem:[#allocation5 + $0x738] sm:$0xff]  ;;  %v164_v9 = vld [vmem:[#allocation5 + $0x330] sm:$0xff]  ;;  %v290_v10 = vld [vmem:[#allocation5 + $0x720] sm:$0xff] }
  0x7a   :  { %1017 = vmatprep.subr.bf16.mxu0 %v1016_v27  ;;  %v274_v27 = vld [vmem:[#allocation5 + $0x6a0] sm:$0xff]  ;;  %v1052_v12 = vpack.c.bf16 %v293_v4, %v291_v3  ;;  %v167_v14 = vld [vmem:[#allocation5 + $0x348] sm:$0xff]  ;;  %v169_v15 = vld [vmem:[#allocation5 + $0x358] sm:$0xff] }
  0x7b   :  { %439 = vmatmul.mubr.f32.vlgmr.msra.gmra.mrb[0].mxu1 %v1311_v25  ;;  %v139_v25 = vld [vmem:[#allocation5 + $0x268] sm:$0xff]  ;;  %v297_v17 = vld [vmem:[#allocation5 + $0x758] sm:$0xff] }
  0x7c   :  { %891 = vmatpush1.bf16.msra.mxu1 %v890_v34  ;;  %581 = vmatmul.mubr.f32.vlgmr.msra.gmra.mrb[0].mxu0 %v1317_v28  ;;  %v1026_v28 = vpack.c.bf16 %v264_v54, %v262_v52  ;;  %v900_v59 = vpack.c.bf16 %v141_v55, %v139_v25  ;;  %v281_v34 = vld [vmem:[#allocation5 + $0x6d8] sm:$0xff]  ;;  %v1044_v52 = vpack.c.bf16 %v285_v45, %v283_v11  ;;  %v159_v54 = vld [vmem:[#allocation5 + $0x308] sm:$0xff] }
  0x7d   :  { %1019 = vmatpush1.bf16.msra.mxu0 %v1018_v35  ;;  %893 = vmatprep.subr.bf16.mxu1 %v892_v36  ;;  %v910_v35 = vpack.c.bf16 %v148_v24, %v146_v23  ;;  %v1038_v36 = vpack.c.bf16 %v276_v22, %v274_v27  ;;  %v1040_v41 = vpack.c.bf16 %v281_v34, %v279_v32  ;;  %v161_v25 = vld [vmem:[#allocation5 + $0x318] sm:$0xff]  ;;  %v287_v55 = vld [vmem:[#allocation5 + $0x708] sm:$0xff]  ;;  %v168_v23 = vld [vmem:[#allocation5 + $0x350] sm:$0xff] }
  0x7e   :  { %1021 = vmatprep.subr.bf16.mxu0 %v1020_v40  ;;  %509 = vmatprep.mubr.f32.mxu1 %v348_v44  ;;  %v278_v40 = vld [vmem:[#allocation5 + $0x6c0] sm:$0xff]  ;;  %v157_v44 = vld [vmem:[#allocation5 + $0x2f8] sm:$0xff]  ;;  %v1048_v63 = vpack.c.bf16 %v289_v56, %v287_v55  ;;  %v1056_v27 = vpack.c.bf16 %v297_v17, %v295_v16  ;;  %v171_v22 = vld [vmem:[#allocation5 + $0x368] sm:$0xff] }
  0x7f   :  { %651 = vmatprep.mubr.f32.mxu0 %v365_v46  ;;  %v914_v46 = vpack.c.bf16 %v152_v39, %v150_v38  ;;  %v294_v24 = vld [vmem:[#allocation5 + $0x740] sm:$0xff]  ;;  %v173_v30 = vld [vmem:[#allocation5 + $0x378] sm:$0xff]  ;;  %v299_v26 = vld [vmem:[#allocation5 + $0x768] sm:$0xff] }
  0x80   :  { %895 = vmatpush1.bf16.msra.mxu1 %v894_v47  ;;  %v1042_v47 = vpack.c.bf16 %v280_v42, %v278_v40  ;;  %v301_v32 = vld [vmem:[#allocation5 + $0x778] sm:$0xff]  ;;  %v172_v38 = vld [vmem:[#allocation5 + $0x370] sm:$0xff]  ;;  %v298_v39 = vld [vmem:[#allocation5 + $0x760] sm:$0xff] }
  0x81   :  { %1023 = vmatpush1.bf16.msra.mxu0 %v1022_v48  ;;  %897 = vmatprep.subr.bf16.mxu1 %v896_v49  ;;  %v916_v48 = vpack.c.bf16 %v157_v44, %v155_v43  ;;  %v154_v49 = vld [vmem:[#allocation5 + $0x2e0] sm:$0xff]  ;;  %v1060_v40 = vpack.c.bf16 %v301_v32, %v299_v26  ;;  %v175_v42 = vld [vmem:[#allocation5 + $0x388] sm:$0xff]  ;;  %v177_v43 = vld [vmem:[#allocation5 + $0x398] sm:$0xff] }
  0x82   :  { %1025 = vmatprep.subr.bf16.mxu0 %v1024_v53  ;;  %v284_v53 = vld [vmem:[#allocation5 + $0x6f0] sm:$0xff]  ;;  %v918_v57 = vpack.c.bf16 %v156_v50, %v154_v49  ;;  %v303_v44 = vld [vmem:[#allocation5 + $0x788] sm:$0xff]  ;;  %v305_v11 = vld [vmem:[#allocation5 + $0x798] sm:$0xff] }
  0x83   :  { %v176_v49 = vld [vmem:[#allocation5 + $0x390] sm:$0xff]  ;;  %v302_v50 = vld [vmem:[#allocation5 + $0x780] sm:$0xff]  ;;  %v309_v55 = vld [vmem:[#allocation5 + $0x7b8] sm:$0xff] }
  0x84   :  { %899 = vmatpush1.bf16.msra.mxu1 %v898_v58  ;;  %v1046_v58 = vpack.c.bf16 %v284_v53, %v282_v51  ;;  %v1064_v51 = vpack.c.bf16 %v305_v11, %v303_v44  ;;  %v179_v53 = vld [vmem:[#allocation5 + $0x3a8] sm:$0xff]  ;;  %v313_v3 = vld [vmem:[#allocation5 + $0x7d8] sm:$0xff] }
  0x85   :  { %1027 = vmatpush1.bf16.msra.mxu0 %v1026_v28  ;;  %901 = vmatprep.subr.bf16.mxu1 %v900_v59  ;;  %v920_v28 = vpack.c.bf16 %v161_v25, %v159_v54  ;;  %v158_v59 = vld [vmem:[#allocation5 + $0x300] sm:$0xff]  ;;  %v181_v54 = vld [vmem:[#allocation5 + $0x3b8] sm:$0xff]  ;;  %v307_v25 = vld [vmem:[#allocation5 + $0x7a8] sm:$0xff] }
  0x86   :  { %1029 = vmatprep.subr.bf16.mxu0 %v1028_v0  ;;  %v288_v0 = vld [vmem:[#allocation5 + $0x710] sm:$0xff]  ;;  %v922_v5 = vpack.c.bf16 %v160_v60, %v158_v59  ;;  %v306_v60 = vld [vmem:[#allocation5 + $0x7a0] sm:$0xff]  ;;  %v317_v16 = vld [vmem:[#allocation5 + $0x7f8] sm:$0xff] }
  0x87   :  { %v180_v59 = vld [vmem:[#allocation5 + $0x3b0] sm:$0xff] }
  0x88   :  { %903 = vmatpush1.bf16.msra.mxu1 %v902_v6  ;;  %v1050_v6 = vpack.c.bf16 %v288_v0, %v286_v62  ;;  %v1068_v62 = vpack.c.bf16 %v309_v55, %v307_v25  ;;  %v183_v0 = vld [vmem:[#allocation5 + $0x3c8] sm:$0xff]  ;;  %v670_v25 = vld [vmem:[#allocation7 + $0x40] sm:$0xff] }
  0x89   :  { %1031 = vmatpush1.bf16.msra.mxu0 %v1030_v7  ;;  %905 = vmatprep.subr.bf16.mxu1 %v904_v8  ;;  %v924_v7 = vpack.c.bf16 %v165_v2, %v163_v1  ;;  %v162_v8 = vld [vmem:[#allocation5 + $0x320] sm:$0xff]  ;;  %v185_v1 = vld [vmem:[#allocation5 + $0x3d8] sm:$0xff]  ;;  %v311_v2 = vld [vmem:[#allocation5 + $0x7c8] sm:$0xff] }
  0x8a   :  { %1033 = vmatprep.subr.bf16.mxu0 %v1032_v13  ;;  %v292_v13 = vld [vmem:[#allocation5 + $0x730] sm:$0xff]  ;;  %v926_v18 = vpack.c.bf16 %v164_v9, %v162_v8  ;;  %v310_v9 = vld [vmem:[#allocation5 + $0x7c0] sm:$0xff]  ;;  %v671_v55 = vld [vmem:[#allocation7 + $0x48] sm:$0xff] }
  0x8b   :  { %v184_v8 = vld [vmem:[#allocation5 + $0x3d0] sm:$0xff] }
  0x8c   :  { %907 = vmatpush1.bf16.msra.mxu1 %v906_v19  ;;  %v1054_v19 = vpack.c.bf16 %v292_v13, %v290_v10  ;;  %v1072_v10 = vpack.c.bf16 %v313_v3, %v311_v2  ;;  %v187_v13 = vld [vmem:[#allocation5 + $0x3e8] sm:$0xff]  ;;  %v674_v2 = vld [vmem:[#allocation7 + $0x60] sm:$0xff] }
  0x8d   :  { %1035 = vmatpush1.bf16.msra.mxu0 %v1034_v20  ;;  %909 = vmatprep.subr.bf16.mxu1 %v908_v21  ;;  %v928_v20 = vpack.c.bf16 %v169_v15, %v167_v14  ;;  %v166_v21 = vld [vmem:[#allocation5 + $0x340] sm:$0xff]  ;;  %v189_v14 = vld [vmem:[#allocation5 + $0x3f8] sm:$0xff]  ;;  %v315_v15 = vld [vmem:[#allocation5 + $0x7e8] sm:$0xff] }
  0x8e   :  { %1037 = vmatprep.subr.bf16.mxu0 %v1036_v29  ;;  %v296_v29 = vld [vmem:[#allocation5 + $0x750] sm:$0xff]  ;;  %v930_v34 = vpack.c.bf16 %v168_v23, %v166_v21  ;;  %v314_v23 = vld [vmem:[#allocation5 + $0x7e0] sm:$0xff]  ;;  %v675_v3 = vld [vmem:[#allocation7 + $0x68] sm:$0xff] }
  0x8f   :  { %v188_v21 = vld [vmem:[#allocation5 + $0x3f0] sm:$0xff] }
  0x90   :  { %911 = vmatpush1.bf16.msra.mxu1 %v910_v35  ;;  %v1058_v35 = vpack.c.bf16 %v296_v29, %v294_v24  ;;  %v1076_v24 = vpack.c.bf16 %v317_v16, %v315_v15  ;;  %v678_v29 = vld [vmem:[#allocation7 + $0x80] sm:$0xff] }
  0x91   :  { %1039 = vmatpush1.bf16.msra.mxu0 %v1038_v36  ;;  %913 = vmatprep.subr.bf16.mxu1 %v912_v37  ;;  %v932_v36 = vpack.c.bf16 %v173_v30, %v171_v22  ;;  %v170_v37 = vld [vmem:[#allocation5 + $0x360] sm:$0xff]  ;;  %v679_v22 = vld [vmem:[#allocation7 + $0x88] sm:$0xff] }
  0x92   :  { %1041 = vmatprep.subr.bf16.mxu0 %v1040_v41  ;;  %v300_v41 = vld [vmem:[#allocation5 + $0x770] sm:$0xff]  ;;  %v934_v45 = vpack.c.bf16 %v172_v38, %v170_v37  ;;  %v1080_v32 = vpack.c.bf16 %v679_v22, %v678_v29  ;;  %v681_v37 = vld [vmem:[#allocation7 + $0x98] sm:$0xff] }
  0x94   :  { %915 = vmatpush1.bf16.msra.mxu1 %v914_v46  ;;  %v1062_v46 = vpack.c.bf16 %v300_v41, %v298_v39  ;;  %v665_v41 = vld [vmem:[#allocation7 + $0x18] sm:$0xff] }
  0x95   :  { %1043 = vmatpush1.bf16.msra.mxu0 %v1042_v47  ;;  %917 = vmatprep.subr.bf16.mxu1 %v916_v48  ;;  %v936_v47 = vpack.c.bf16 %v177_v43, %v175_v42  ;;  %v174_v48 = vld [vmem:[#allocation5 + $0x380] sm:$0xff]  ;;  %v683_v43 = vld [vmem:[#allocation7 + $0xa8] sm:$0xff] }
  0x96   :  { %1045 = vmatprep.subr.bf16.mxu0 %v1044_v52  ;;  %v304_v52 = vld [vmem:[#allocation5 + $0x790] sm:$0xff]  ;;  %v938_v56 = vpack.c.bf16 %v176_v49, %v174_v48  ;;  %v682_v42 = vld [vmem:[#allocation7 + $0xa0] sm:$0xff]  ;;  %v685_v49 = vld [vmem:[#allocation7 + $0xb8] sm:$0xff] }
  0x97   :  { %v1088_v11 = vpack.c.bf16 %v683_v43, %v682_v42  ;;  %v684_v48 = vld [vmem:[#allocation7 + $0xb0] sm:$0xff] }
  0x98   :  { %919 = vmatpush1.bf16.msra.mxu1 %v918_v57  ;;  %v1066_v57 = vpack.c.bf16 %v304_v52, %v302_v50  ;;  %v1092_v50 = vpack.c.bf16 %v685_v49, %v684_v48  ;;  %v669_v52 = vld [vmem:[#allocation7 + $0x38] sm:$0xff] }
  0x99   :  { %1047 = vmatpush1.bf16.msra.mxu0 %v1046_v58  ;;  %921 = vmatprep.subr.bf16.mxu1 %v920_v28  ;;  %v940_v58 = vpack.c.bf16 %v181_v54, %v179_v53  ;;  %v178_v28 = vld [vmem:[#allocation5 + $0x3a0] sm:$0xff] }
  0x9a   :  { %1049 = vmatprep.subr.bf16.mxu0 %v1048_v63  ;;  %v308_v63 = vld [vmem:[#allocation5 + $0x7b0] sm:$0xff]  ;;  %v942_v4 = vpack.c.bf16 %v180_v59, %v178_v28 }
  0x9b   :  { %v672_v59 = vld [vmem:[#allocation7 + $0x50] sm:$0xff] }
  0x9c   :  { %923 = vmatpush1.bf16.msra.mxu1 %v922_v5  ;;  %v1070_v5 = vpack.c.bf16 %v308_v63, %v306_v60  ;;  %v673_v60 = vld [vmem:[#allocation7 + $0x58] sm:$0xff]  ;;  %v690_v63 = vld [vmem:[#allocation7 + $0xe0] sm:$0xff] }
  0x9d   :  { %1051 = vmatpush1.bf16.msra.mxu0 %v1050_v6  ;;  %925 = vmatprep.subr.bf16.mxu1 %v924_v7  ;;  %v944_v6 = vpack.c.bf16 %v185_v1, %v183_v0  ;;  %v182_v7 = vld [vmem:[#allocation5 + $0x3c0] sm:$0xff]  ;;  %v691_v0 = vld [vmem:[#allocation7 + $0xe8] sm:$0xff] }
  0x9e   :  { %1053 = vmatprep.subr.bf16.mxu0 %v1052_v12  ;;  %v312_v12 = vld [vmem:[#allocation5 + $0x7d0] sm:$0xff]  ;;  %v946_v17 = vpack.c.bf16 %v184_v8, %v182_v7  ;;  %v1104_v1 = vpack.c.bf16 %v691_v0, %v690_v63 }
  0x9f   :  { %v676_v8 = vld [vmem:[#allocation7 + $0x70] sm:$0xff] }
  0xa0   :  { %927 = vmatpush1.bf16.msra.mxu1 %v926_v18  ;;  %v1074_v18 = vpack.c.bf16 %v312_v12, %v310_v9  ;;  %v677_v9 = vld [vmem:[#allocation7 + $0x78] sm:$0xff]  ;;  %v322_v12 = vsub.s32 0, %v1302_v61 }
  0xa1   :  { %1055 = vmatpush1.bf16.msra.mxu0 %v1054_v19  ;;  %929 = vmatprep.subr.bf16.mxu1 %v928_v20  ;;  %v948_v19 = vpack.c.bf16 %v189_v14, %v187_v13  ;;  %v186_v20 = vld [vmem:[#allocation5 + $0x3e0] sm:$0xff]  ;;  %v318_v13 = vld [vmem:[%s1363_s2] sm:$0x3]  ;;  %v326_v14 = vsub.s32 1, %v1302_v61 }
  0xa2   :  { %1057 = vmatprep.subr.bf16.mxu0 %v1056_v27  ;;  %v316_v27 = vld [vmem:[#allocation5 + $0x7f0] sm:$0xff]  ;;  %v950_v30 = vpack.c.bf16 %v188_v21, %v186_v20  ;;  %v323_v15 = vrot.slane %v318_v13, %v322_v12 }
  0xa3   :  { %v1078_v26 = vpack.c.bf16 %v316_v27, %v314_v23  ;;  %v327_v16 = vrot.slane %v318_v13, %v326_v14  ;;  %v788_v61 = vld [vmem:[%s1365_s4] ss:$0 sm:$0xff] }
  0xa4   :  { %931 = vmatpush1.bf16.msra.mxu1 %v930_v34  ;;  %v662_v34 = vld [vmem:[#allocation7] sm:$0xff] }
  0xa5   :  { %1059 = vmatpush1.bf16.msra.mxu0 %v1058_v35  ;;  %933 = vmatprep.subr.bf16.mxu1 %v932_v36  ;;  %v663_v35 = vld [vmem:[#allocation7 + $0x8] sm:$0xff]  ;;  %v680_v36 = vld [vmem:[#allocation7 + $0x90] sm:$0xff] }
  0xa6   :  { %1061 = vmatprep.subr.bf16.mxu0 %v1060_v40  ;;  %v1082_v38 = vpack.c.bf16 %v663_v35, %v662_v34  ;;  %v1084_v39 = vpack.c.bf16 %v681_v37, %v680_v36  ;;  %v664_v40 = vld [vmem:[#allocation7 + $0x10] sm:$0xff] }
  0xa7   :  { %v1086_v44 = vpack.c.bf16 %v665_v41, %v664_v40 }
  0xa8   :  { %935 = vmatpush1.bf16.msra.mxu1 %v934_v45  ;;  %v666_v45 = vld [vmem:[#allocation7 + $0x20] sm:$0xff] }
  0xa9   :  { %1063 = vmatpush1.bf16.msra.mxu0 %v1062_v46  ;;  %937 = vmatprep.subr.bf16.mxu1 %v936_v47  ;;  %v667_v46 = vld [vmem:[#allocation7 + $0x28] sm:$0xff] }
  0xaa   :  { %1065 = vmatprep.subr.bf16.mxu0 %v1064_v51  ;;  %v1090_v47 = vpack.c.bf16 %v667_v46, %v666_v45  ;;  %v668_v51 = vld [vmem:[#allocation7 + $0x30] sm:$0xff] }
  0xab   :  { %v1094_v53 = vpack.c.bf16 %v669_v52, %v668_v51 }
  0xac   :  { %939 = vmatpush1.bf16.msra.mxu1 %v938_v56  ;;  %v1098_v56 = vpack.c.bf16 %v671_v55, %v670_v25 }
  0xad   :  { %1067 = vmatpush1.bf16.msra.mxu0 %v1066_v57  ;;  %941 = vmatprep.subr.bf16.mxu1 %v940_v58  ;;  %v688_v57 = vld [vmem:[#allocation7 + $0xd0] sm:$0xff]  ;;  %v689_v58 = vld [vmem:[#allocation7 + $0xd8] sm:$0xff] }
  0xae   :  { %1069 = vmatprep.subr.bf16.mxu0 %v1068_v62  ;;  %v1100_v28 = vpack.c.bf16 %v689_v58, %v688_v57  ;;  %v1102_v62 = vpack.c.bf16 %v673_v60, %v672_v59 }
  0xb0   :  { %943 = vmatpush1.bf16.msra.mxu1 %v942_v4  ;;  %v1106_v4 = vpack.c.bf16 %v675_v3, %v674_v2 }
  0xb1   :  { %1071 = vmatpush1.bf16.msra.mxu0 %v1070_v5  ;;  %945 = vmatprep.subr.bf16.mxu1 %v944_v6  ;;  %v692_v5 = vld [vmem:[#allocation7 + $0xf0] sm:$0xff]  ;;  %v693_v6 = vld [vmem:[#allocation7 + $0xf8] sm:$0xff] }
  0xb2   :  { %1073 = vmatprep.subr.bf16.mxu0 %v1072_v10  ;;  %v1108_v7 = vpack.c.bf16 %v693_v6, %v692_v5  ;;  %v1110_v10 = vpack.c.bf16 %v677_v9, %v676_v8 }
  0xb4   :  { %947 = vmatpush1.bf16.msra.mxu1 %v946_v17 }
  0xb5   :  { %1075 = vmatpush1.bf16.msra.mxu0 %v1074_v18  ;;  %949 = vmatprep.subr.bf16.mxu1 %v948_v19 }
  0xb6   :  { %1077 = vmatprep.subr.bf16.mxu0 %v1076_v24 }
  0xb8   :  { %951 = vmatpush1.bf16.msra.mxu1 %v950_v30 }
  0xb9   :  { %1079 = vmatpush1.bf16.msra.mxu0 %v1078_v26  ;;  %1081 = vmatprep.subr.bf16.mxu1 %v1080_v32 }
  0xbb   :  { %510 = vmatmul.mubr.f32.vlgmr.msra.gmra.mrb[0].mxu1 %v1328_v31  ;;  %v686_v31 = vld [vmem:[#allocation7 + $0xc0] sm:$0xff] }
  0xbc   :  { %652 = vmatmul.mubr.f32.vlgmr.msra.gmra.mrb[0].mxu0 %v1331_v33  ;;  %1083 = vmatpush3.bf16.msra.mxu1 %v1082_v38  ;;  %v687_v33 = vld [vmem:[#allocation7 + $0xc8] sm:$0xff] }
  0xbd   :  { %1085 = vmatprep.subr.bf16.mxu1 %v1084_v39  ;;  %v1096_v54 = vpack.c.bf16 %v687_v33, %v686_v31 }
  0xc0   :  { %1087 = vmatpush3.bf16.msra.mxu1 %v1086_v44 }
  0xc1   :  { %1089 = vmatprep.subr.bf16.mxu1 %v1088_v11 }
  0xc4   :  { %1091 = vmatpush3.bf16.msra.mxu1 %v1090_v47 }
  0xc5   :  { %1093 = vmatprep.subr.bf16.mxu1 %v1092_v50 }
  0xc8   :  { %1095 = vmatpush3.bf16.msra.mxu1 %v1094_v53 }
  0xc9   :  { %1097 = vmatprep.subr.bf16.mxu1 %v1096_v54 }
  0xcc   :  { %1099 = vmatpush3.bf16.msra.mxu1 %v1098_v56 }
  0xcd   :  { %1101 = vmatprep.subr.bf16.mxu1 %v1100_v28 }
  0xd0   :  { %1103 = vmatpush3.bf16.msra.mxu1 %v1102_v62 }
  0xd1   :  { %1105 = vmatprep.subr.bf16.mxu1 %v1104_v1 }
  0xd4   :  { %1107 = vmatpush3.bf16.msra.mxu1 %v1106_v4 }
  0xd5   :  { %1109 = vmatprep.subr.bf16.mxu1 %v1108_v7 }
  0xd8   :  { %1111 = vmatpush3.bf16.msra.mxu1 %v1110_v10 }
 0x18e   :  { %v511_v17 = vpop.f32.mrb[0].mxu1 }
 0x18f   :  { %v1112_v18 = vadd.f32 %v511_v17, %v323_v15  ;;  %v653_v19 = vpop.f32.mrb[0].mxu0  ;;  %v513_v20 = vpop.f32.mrb[1].mxu1 }
 0x190   :  { %v1114_v21 = vadd.f32 %v513_v20, %v327_v16  ;;  %v655_v23 = vpop.f32.mrb[1].mxu0 }
 0x191   :  { %v1113_v24 = vadd.f32 %v1112_v18, %v653_v19 }
 0x192   :  { %v1115_v27 = vadd.f32 %v1114_v21, %v655_v23 }
 0x193   :  { %1131 = vtanh.f32 %v1113_v24 }
 0x19d   :  { %v1132_v29 = vpop.eup %1131 }
 0x19e   :  { %v659_v22 = vmul.f32 %v1132_v29, %v1132_v29  ;;  %765 = vmatprep.mubr.f32.mxu1 %v1132_v29 }
 0x1a0   :  { %v660_v30 = vsub.f32 1.0, %v659_v22 }
 0x1a2   :  { %v661_v26 = vmul.f32 %v1115_v27, %v660_v30 }
 0x1a4   :  { %766 = vmatmul.mubr.f32.vlgmr.msra.gmra.mrb[2].mxu1 %v661_v26 }
 0x277   :  { %v821_v32 = vpop.f32.mrb[2].mxu1 }
 0x278   :  { %v822_v34 = vpop.f32.mrb[3].mxu1 }
 0x279   :  { %v823_v35 = vadd.f32 %v822_v34, %v821_v32 }
 0x27b   :  { %v768_v36 = vadd.f32 %v823_v35, %v788_v61 }
 0x27d   :  { %771 = vst [vmem:[#allocation8] sm:$0x3] %v768_v36 }
 0x27e   :  { %1210 = shalt.err (!%p1207_p0)
}
 0x27f   :  { %s1211_s13 = scalar_lea.hbm %s1366_s5, 32 }
 0x280   :  { %p1212_p1 = scmp.ne.s32.totalorder %s1366_s5, %s1211_s13  ;;  %p1215_p2 = scmp.lt.u32.totalorder %s1211_s13, %s1366_s5 }
 0x282   :  { %p1217_p3 = pnand %p1215_p2, %p1212_p1 }
 0x284   :  { %1220 = shalt.err (!%p1217_p3)
}
 0x285   :  { %781 = dma.vmem_to_hbm [thread:$0]  %s779_s9, 32, %s1366_s5, [#allocation4]  }
 0x286   :  { %1225 = dma.done.wait [#allocation4], 32  }
 0x287   :  { %1226 = vsyncadd [#allocation4], 4294967264 }
 0x288   :  { %785 = vsyncpa [#allocation3], 1 }
 0x289   :  { %786 = vsyncpa [#allocation6], 1 }
 0x28a   :  { %787 = vsyncpa [#allocation4], 1 }

// kernel: tpu_custom_call.1
= control target key start
LH: loop header
LB: loop body
LE: loop exit
PB: predicated region body
PF: predicated region fallthrough
CT: control target
= control target key end

     0   :  { %10 = vsyncpa [#allocation3], 0  ;;  %s1361_s0 = inlined_call_operand.hbm [shape: f32[2,1024], index: 0, kind: input, shape index: {}]   ;;  %s1362_s1 = inlined_call_operand.hbm [shape: f32[1024,256], index: 1, kind: input, shape index: {}]   ;;  %s1363_s2 = inlined_call_operand.vmem [shape: f32[1,256], index: 2, kind: input, shape index: {}]   ;;  %s1364_s3 = inlined_call_operand.hbm [shape: f32[256,128], index: 3, kind: input, shape index: {}]   ;;  %s1365_s4 = inlined_call_operand.vmem [shape: f32[1,128], index: 4, kind: input, shape index: {}]   ;;  %s1366_s5 = inlined_call_operand.hbm [shape: f32[2,128], index: 5, kind: output, shape index: {}]  }
   0x1   :  { %11 = vsyncpa [#allocation6], 0 }
   0x2   :  { %12 = vsyncpa [#allocation4], 0  ;;  %s1227_s18 = smov [#allocation5]   ;;  %s1133_s22 = scalar_lea.hbm %s1362_s1, 32768 }
   0x3   :  { %s28_s19 = sshll.u32 %s1227_s18, 4  ;;  %p1134_p0 = scmp.ne.s32.totalorder %s1362_s1, %s1133_s22  ;;  %s29_s19 = int_to_ptr.vmem [resolvable:$true] %s28_s19 }
   0x4   :  { %p1137_p1 = scmp.lt.u32.totalorder %s1133_s22, %s1362_s1 }
   0x6   :  { %p1139_p2 = pnand %p1137_p1, %p1134_p0 }
   0x8   :  { %1142 = shalt.err (!%p1139_p2)
}
   0x9   :  { %s1143_s27 = scalar_lea.vmem %s29_s19, 32768  ;;  %p1148_p4 = scmp.lt.s32.totalorder %s29_s19, %s29_s19 }
   0xa   :  { %p1144_p3 = scmp.ne.s32.totalorder %s29_s19, %s1143_s27  ;;  %p1149_p5 = scmp.lt.s32.totalorder %s1143_s27, %s1143_s27 }
   0xc   :  { %p1150_p6 = por %p1149_p5, %p1148_p4 }
   0xe   :  { %p1151_p7 = pnand %p1150_p6, %p1144_p3 }
  0x10   :  { %1154 = shalt.err (!%p1151_p7)
}
  0x11   :  { %s1228_s28 = smov 256   ;;  %s1229_s29 = smov 16  }
  0x12   :  { %34 = dma.hbm_to_vmem [thread:$0]  %s1362_s1, 32768, %s29_s19, [#allocation6], %s1228_s28, %s1228_s28, %s1229_s29  }
  0x13   :  { %s1230_s7 = smov [#allocation2]   ;;  %s1231_s9 = smov [#allocation7]  }
  0x14   :  { %s19_s8 = sshll.u32 %s1230_s7, 4  ;;  %s42_s10 = sshll.u32 %s1231_s9, 4  ;;  %s20_s8 = int_to_ptr.vmem [resolvable:$true] %s19_s8  ;;  %s43_s10 = int_to_ptr.vmem [resolvable:$true] %s42_s10 }
  0x15   :  { %s1155_s13 = scalar_lea.hbm %s1361_s0, 256 }
  0x16   :  { %p1156_p8 = scmp.ne.s32.totalorder %s1361_s0, %s1155_s13  ;;  %p1159_p9 = scmp.lt.u32.totalorder %s1155_s13, %s1361_s0 }
  0x18   :  { %p1161_p10 = pnand %p1159_p9, %p1156_p8 }
  0x1a   :  { %1164 = shalt.err (!%p1161_p10)
}
  0x1b   :  { %s1165_s1 = scalar_lea.vmem %s20_s8, 256  ;;  %p1170_p12 = scmp.lt.s32.totalorder %s20_s8, %s20_s8 }
  0x1c   :  { %p1166_p11 = scmp.ne.s32.totalorder %s20_s8, %s1165_s1  ;;  %p1171_p13 = scmp.lt.s32.totalorder %s1165_s1, %s1165_s1 }
  0x1e   :  { %p1172_p0 = por %p1171_p13, %p1170_p12 }
  0x20   :  { %p1173_p1 = pnand %p1172_p0, %p1166_p11 }
  0x22   :  { %1176 = shalt.err (!%p1173_p1)
}
  0x23   :  { %22 = dma.hbm_to_vmem [thread:$0]  %s1361_s0, 256, %s20_s8, [#allocation3]  }
  0x24   :  { %s1177_s22 = scalar_lea.hbm %s1364_s3, 4096 }
  0x25   :  { %p1178_p2 = scmp.ne.s32.totalorder %s1364_s3, %s1177_s22  ;;  %p1181_p3 = scmp.lt.u32.totalorder %s1177_s22, %s1364_s3 }
  0x27   :  { %p1183_p4 = pnand %p1181_p3, %p1178_p2 }
  0x29   :  { %1186 = shalt.err (!%p1183_p4)
}
  0x2a   :  { %s1187_s27 = scalar_lea.vmem %s43_s10, 4096  ;;  %p1192_p6 = scmp.lt.s32.totalorder %s43_s10, %s43_s10 }
  0x2b   :  { %p1188_p5 = scmp.ne.s32.totalorder %s43_s10, %s1187_s27  ;;  %p1193_p7 = scmp.lt.s32.totalorder %s1187_s27, %s1187_s27 }
  0x2d   :  { %p1194_p8 = por %p1193_p7, %p1192_p6 }
  0x2f   :  { %p1195_p9 = pnand %p1194_p8, %p1188_p5 }
  0x31   :  { %1198 = shalt.err (!%p1195_p9)
}
  0x32   :  { %s1232_s0 = smov 128   ;;  %s1233_s28 = smov 8  }
  0x33   :  { %48 = dma.hbm_to_vmem [thread:$0]  %s1364_s3, 4096, %s43_s10, [#allocation6], %s1232_s0, %s1232_s0, %s1233_s28  }
  0x34   :  { %1221 = dma.done.wait [#allocation3], 256  }
  0x35   :  { %1222 = vsyncadd [#allocation3], 4294967040 }
  0x36   :  { %1223 = dma.done.wait [#allocation6], 36864  }
  0x37   :  { %1224 = vsyncadd [#allocation6], 4294930432  ;;  %v63_v0 = vld [vmem:[#allocation5 + $0x8] sm:$0xff]  ;;  %v65_v1 = vld [vmem:[#allocation5 + $0x18] sm:$0xff]  ;;  %s1235_s8 = smov [#allocation8]  }
  0x38   :  { %v191_v2 = vld [vmem:[#allocation5 + $0x408] sm:$0xff]  ;;  %v824_v3 = vpack.c.bf16 %v65_v1, %v63_v0  ;;  %v193_v4 = vld [vmem:[#allocation5 + $0x418] sm:$0xff]  ;;  %v62_v5 = vld [vmem:[#allocation5] sm:$0xff]  ;;  %s778_s9 = sshll.u32 %s1235_s8, 4  ;;  %s779_s9 = int_to_ptr.vmem [resolvable:$true] %s778_s9 }
  0x39   :  { %v64_v6 = vld [vmem:[#allocation5 + $0x10] sm:$0xff]  ;;  %v952_v7 = vpack.c.bf16 %v193_v4, %v191_v2  ;;  %v190_v9 = vld [vmem:[#allocation5 + $0x400] sm:$0xff]  ;;  %v67_v11 = vld [vmem:[#allocation5 + $0x28] sm:$0xff]  ;;  %s1199_s10 = scalar_lea.vmem %s779_s9, 32  ;;  %p1204_p11 = scmp.lt.s32.totalorder %s779_s9, %s779_s9 }
  0x3a   :  { %v826_v8 = vpack.c.bf16 %v64_v6, %v62_v5  ;;  %v192_v10 = vld [vmem:[#allocation5 + $0x410] sm:$0xff]  ;;  %825 = vmatprep.subr.bf16.mxu1 %v824_v3  ;;  %v69_v13 = vld [vmem:[#allocation5 + $0x38] sm:$0xff]  ;;  %v195_v14 = vld [vmem:[#allocation5 + $0x428] sm:$0xff]  ;;  %p1200_p10 = scmp.ne.s32.totalorder %s779_s9, %s1199_s10  ;;  %p1205_p12 = scmp.lt.s32.totalorder %s1199_s10, %s1199_s10 }
  0x3b   :  { %v954_v12 = vpack.c.bf16 %v192_v10, %v190_v9  ;;  %v197_v15 = vld [vmem:[#allocation5 + $0x438] sm:$0xff]  ;;  %953 = vmatprep.subr.bf16.mxu0 %v952_v7  ;;  %v828_v16 = vpack.c.bf16 %v69_v13, %v67_v11  ;;  %v66_v18 = vld [vmem:[#allocation5 + $0x20] sm:$0xff]  ;;  %v68_v19 = vld [vmem:[#allocation5 + $0x30] sm:$0xff] }
  0x3c   :  { %827 = vmatpush1.bf16.msra.mxu1 %v826_v8  ;;  %v956_v17 = vpack.c.bf16 %v197_v15, %v195_v14  ;;  %v194_v20 = vld [vmem:[#allocation5 + $0x420] sm:$0xff]  ;;  %v830_v21 = vpack.c.bf16 %v68_v19, %v66_v18  ;;  %v196_v22 = vld [vmem:[#allocation5 + $0x430] sm:$0xff]  ;;  %v71_v23 = vld [vmem:[#allocation5 + $0x48] sm:$0xff]  ;;  %p1206_p13 = por %p1205_p12, %p1204_p11 }
  0x3d   :  { %955 = vmatpush1.bf16.msra.mxu0 %v954_v12  ;;  %v73_v24 = vld [vmem:[#allocation5 + $0x58] sm:$0xff]  ;;  %829 = vmatprep.subr.bf16.mxu1 %v828_v16  ;;  %v958_v25 = vpack.c.bf16 %v196_v22, %v194_v20  ;;  %v199_v27 = vld [vmem:[#allocation5 + $0x448] sm:$0xff]  ;;  %v70_v29 = vld [vmem:[#allocation5 + $0x40] sm:$0xff] }
  0x3e   :  { %957 = vmatprep.subr.bf16.mxu0 %v956_v17  ;;  %v832_v26 = vpack.c.bf16 %v73_v24, %v71_v23  ;;  %v201_v28 = vld [vmem:[#allocation5 + $0x458] sm:$0xff]  ;;  %v72_v31 = vld [vmem:[#allocation5 + $0x50] sm:$0xff]  ;;  %v198_v32 = vld [vmem:[#allocation5 + $0x440] sm:$0xff]  ;;  %p1207_p0 = pnand %p1206_p13, %p1200_p10 }
  0x3f   :  { %v960_v30 = vpack.c.bf16 %v201_v28, %v199_v27  ;;  %v200_v33 = vld [vmem:[#allocation5 + $0x450] sm:$0xff]  ;;  %v834_v34 = vpack.c.bf16 %v72_v31, %v70_v29  ;;  %v75_v35 = vld [vmem:[#allocation5 + $0x68] sm:$0xff]  ;;  %v77_v36 = vld [vmem:[#allocation5 + $0x78] sm:$0xff] }
  0x40   :  { %831 = vmatpush1.bf16.msra.mxu1 %v830_v21  ;;  %v203_v37 = vld [vmem:[#allocation5 + $0x468] sm:$0xff]  ;;  %v962_v38 = vpack.c.bf16 %v200_v33, %v198_v32  ;;  %v836_v39 = vpack.c.bf16 %v77_v36, %v75_v35  ;;  %v205_v40 = vld [vmem:[#allocation5 + $0x478] sm:$0xff]  ;;  %v74_v41 = vld [vmem:[#allocation5 + $0x60] sm:$0xff] }
  0x41   :  { %959 = vmatpush1.bf16.msra.mxu0 %v958_v25  ;;  %833 = vmatprep.subr.bf16.mxu1 %v832_v26  ;;  %v76_v42 = vld [vmem:[#allocation5 + $0x70] sm:$0xff]  ;;  %v964_v43 = vpack.c.bf16 %v205_v40, %v203_v37  ;;  %v202_v44 = vld [vmem:[#allocation5 + $0x460] sm:$0xff]  ;;  %v79_v46 = vld [vmem:[#allocation5 + $0x88] sm:$0xff] }
  0x42   :  { %961 = vmatprep.subr.bf16.mxu0 %v960_v30  ;;  %v204_v45 = vld [vmem:[#allocation5 + $0x470] sm:$0xff]  ;;  %v81_v47 = vld [vmem:[#allocation5 + $0x98] sm:$0xff]  ;;  %v207_v48 = vld [vmem:[#allocation5 + $0x488] sm:$0xff]  ;;  %v838_v50 = vpack.c.bf16 %v76_v42, %v74_v41 }
  0x43   :  { %v209_v49 = vld [vmem:[#allocation5 + $0x498] sm:$0xff]  ;;  %v966_v51 = vpack.c.bf16 %v204_v45, %v202_v44  ;;  %v840_v52 = vpack.c.bf16 %v81_v47, %v79_v46  ;;  %v78_v53 = vld [vmem:[#allocation5 + $0x80] sm:$0xff]  ;;  %v80_v54 = vld [vmem:[#allocation5 + $0x90] sm:$0xff]  ;;  %v320_v46 = vlaneseq  ;;  %v1234_v47 = vmov 1983009808  }
  0x44   :  { %835 = vmatpush1.bf16.msra.mxu1 %v834_v34  ;;  %v206_v55 = vld [vmem:[#allocation5 + $0x480] sm:$0xff]  ;;  %v968_v56 = vpack.c.bf16 %v209_v49, %v207_v48  ;;  %v208_v57 = vld [vmem:[#allocation5 + $0x490] sm:$0xff]  ;;  %v83_v58 = vld [vmem:[#allocation5 + $0xa8] sm:$0xff]  ;;  %v842_v62 = vpack.c.bf16 %v80_v54, %v78_v53  ;;  %v334_v48 = vunpack.c.l.s4 %v1234_v47 }
  0x45   :  { %963 = vmatpush1.bf16.msra.mxu0 %v962_v38  ;;  %837 = vmatprep.subr.bf16.mxu1 %v836_v39  ;;  %v85_v59 = vld [vmem:[#allocation5 + $0xb8] sm:$0xff]  ;;  %v211_v60 = vld [vmem:[#allocation5 + $0x4a8] sm:$0xff]  ;;  %v970_v63 = vpack.c.bf16 %v208_v57, %v206_v55  ;;  %v82_v1 = vld [vmem:[#allocation5 + $0xa0] sm:$0xff] }
  0x46   :  { %965 = vmatprep.subr.bf16.mxu0 %v964_v43  ;;  %v213_v61 = vld [vmem:[#allocation5 + $0x4b8] sm:$0xff]  ;;  %v844_v0 = vpack.c.bf16 %v85_v59, %v83_v58  ;;  %v84_v2 = vld [vmem:[#allocation5 + $0xb0] sm:$0xff]  ;;  %v210_v3 = vld [vmem:[#allocation5 + $0x4a0] sm:$0xff] }
  0x47   :  { %v972_v4 = vpack.c.bf16 %v213_v61, %v211_v60  ;;  %v212_v5 = vld [vmem:[#allocation5 + $0x4b0] sm:$0xff]  ;;  %v87_v6 = vld [vmem:[#allocation5 + $0xc8] sm:$0xff]  ;;  %v89_v7 = vld [vmem:[#allocation5 + $0xd8] sm:$0xff]  ;;  %v846_v10 = vpack.c.bf16 %v84_v2, %v82_v1  ;;  %v1302_v61 = vshrl.u32 %v320_v46, 7 }
  0x48   :  { %839 = vmatpush1.bf16.msra.mxu1 %v838_v50  ;;  %v215_v8 = vld [vmem:[#allocation5 + $0x4c8] sm:$0xff]  ;;  %v217_v9 = vld [vmem:[#allocation5 + $0x4d8] sm:$0xff]  ;;  %v974_v11 = vpack.c.bf16 %v212_v5, %v210_v3  ;;  %v848_v12 = vpack.c.bf16 %v89_v7, %v87_v6  ;;  %v86_v13 = vld [vmem:[#allocation5 + $0xc0] sm:$0xff] }
  0x49   :  { %967 = vmatpush1.bf16.msra.mxu0 %v966_v51  ;;  %841 = vmatprep.subr.bf16.mxu1 %v840_v52  ;;  %v88_v14 = vld [vmem:[#allocation5 + $0xd0] sm:$0xff]  ;;  %v214_v15 = vld [vmem:[#allocation5 + $0x4c0] sm:$0xff]  ;;  %v976_v16 = vpack.c.bf16 %v217_v9, %v215_v8  ;;  %v91_v18 = vld [vmem:[#allocation5 + $0xe8] sm:$0xff] }
  0x4a   :  { %969 = vmatprep.subr.bf16.mxu0 %v968_v56  ;;  %v216_v17 = vld [vmem:[#allocation5 + $0x4d0] sm:$0xff]  ;;  %v93_v19 = vld [vmem:[#allocation5 + $0xf8] sm:$0xff]  ;;  %v219_v20 = vld [vmem:[#allocation5 + $0x4e8] sm:$0xff]  ;;  %v850_v22 = vpack.c.bf16 %v88_v14, %v86_v13 }
  0x4b   :  { %v221_v21 = vld [vmem:[#allocation5 + $0x4f8] sm:$0xff]  ;;  %v978_v23 = vpack.c.bf16 %v216_v17, %v214_v15  ;;  %v852_v24 = vpack.c.bf16 %v93_v19, %v91_v18  ;;  %v90_v25 = vld [vmem:[#allocation5 + $0xe0] sm:$0xff]  ;;  %v92_v26 = vld [vmem:[#allocation5 + $0xf0] sm:$0xff] }
  0x4c   :  { %843 = vmatpush1.bf16.msra.mxu1 %v842_v62  ;;  %v218_v27 = vld [vmem:[#allocation5 + $0x4e0] sm:$0xff]  ;;  %v980_v28 = vpack.c.bf16 %v221_v21, %v219_v20  ;;  %v220_v29 = vld [vmem:[#allocation5 + $0x4f0] sm:$0xff]  ;;  %v95_v30 = vld [vmem:[#allocation5 + $0x108] sm:$0xff]  ;;  %v854_v34 = vpack.c.bf16 %v92_v26, %v90_v25  ;;  %v335_v62 = vunpack.c.0.s8 %v334_v48 }
  0x4d   :  { %971 = vmatpush1.bf16.msra.mxu0 %v970_v63  ;;  %845 = vmatprep.subr.bf16.mxu1 %v844_v0  ;;  %v97_v31 = vld [vmem:[#allocation5 + $0x118] sm:$0xff]  ;;  %v223_v32 = vld [vmem:[#allocation5 + $0x508] sm:$0xff]  ;;  %v982_v35 = vpack.c.bf16 %v220_v29, %v218_v27  ;;  %v94_v37 = vld [vmem:[#allocation5 + $0x100] sm:$0xff] }
  0x4e   :  { %973 = vmatprep.subr.bf16.mxu0 %v972_v4  ;;  %v225_v33 = vld [vmem:[#allocation5 + $0x518] sm:$0xff]  ;;  %v856_v36 = vpack.c.bf16 %v97_v31, %v95_v30  ;;  %v96_v38 = vld [vmem:[#allocation5 + $0x110] sm:$0xff]  ;;  %v222_v39 = vld [vmem:[#allocation5 + $0x500] sm:$0xff] }
  0x4f   :  { %v984_v40 = vpack.c.bf16 %v225_v33, %v223_v32  ;;  %v224_v41 = vld [vmem:[#allocation5 + $0x510] sm:$0xff]  ;;  %v99_v42 = vld [vmem:[#allocation5 + $0x128] sm:$0xff]  ;;  %v101_v43 = vld [vmem:[#allocation5 + $0x138] sm:$0xff]  ;;  %v858_v49 = vpack.c.bf16 %v96_v38, %v94_v37 }
  0x50   :  { %847 = vmatpush1.bf16.msra.mxu1 %v846_v10  ;;  %v227_v44 = vld [vmem:[#allocation5 + $0x528] sm:$0xff]  ;;  %v229_v45 = vld [vmem:[#allocation5 + $0x538] sm:$0xff]  ;;  %v986_v50 = vpack.c.bf16 %v224_v41, %v222_v39  ;;  %v860_v51 = vpack.c.bf16 %v101_v43, %v99_v42  ;;  %v98_v52 = vld [vmem:[#allocation5 + $0x120] sm:$0xff] }
  0x51   :  { %975 = vmatpush1.bf16.msra.mxu0 %v974_v11  ;;  %849 = vmatprep.subr.bf16.mxu1 %v848_v12  ;;  %v100_v53 = vld [vmem:[#allocation5 + $0x130] sm:$0xff]  ;;  %v226_v54 = vld [vmem:[#allocation5 + $0x520] sm:$0xff]  ;;  %v988_v55 = vpack.c.bf16 %v229_v45, %v227_v44  ;;  %v103_v57 = vld [vmem:[#allocation5 + $0x148] sm:$0xff]  ;;  %v1305_v11 = vsub.s32 %v335_v62, %v1302_v61 }
  0x52   :  { %977 = vmatprep.subr.bf16.mxu0 %v976_v16  ;;  %v228_v56 = vld [vmem:[#allocation5 + $0x530] sm:$0xff]  ;;  %v105_v58 = vld [vmem:[#allocation5 + $0x158] sm:$0xff]  ;;  %v231_v59 = vld [vmem:[#allocation5 + $0x548] sm:$0xff]  ;;  %v862_v63 = vpack.c.bf16 %v100_v53, %v98_v52 }
  0x53   :  { %v233_v60 = vld [vmem:[#allocation5 + $0x558] sm:$0xff]  ;;  %v990_v0 = vpack.c.bf16 %v228_v56, %v226_v54  ;;  %v864_v1 = vpack.c.bf16 %v105_v58, %v103_v57  ;;  %v102_v2 = vld [vmem:[#allocation5 + $0x140] sm:$0xff]  ;;  %v104_v3 = vld [vmem:[#allocation5 + $0x150] sm:$0xff] }
  0x54   :  { %851 = vmatpush1.bf16.msra.mxu1 %v850_v22  ;;  %v230_v4 = vld [vmem:[#allocation5 + $0x540] sm:$0xff]  ;;  %v992_v5 = vpack.c.bf16 %v233_v60, %v231_v59  ;;  %v232_v6 = vld [vmem:[#allocation5 + $0x550] sm:$0xff]  ;;  %v107_v7 = vld [vmem:[#allocation5 + $0x168] sm:$0xff]  ;;  %v866_v12 = vpack.c.bf16 %v104_v3, %v102_v2 }
  0x55   :  { %979 = vmatpush1.bf16.msra.mxu0 %v978_v23  ;;  %853 = vmatprep.subr.bf16.mxu1 %v852_v24  ;;  %v109_v8 = vld [vmem:[#allocation5 + $0x178] sm:$0xff]  ;;  %v235_v9 = vld [vmem:[#allocation5 + $0x568] sm:$0xff]  ;;  %v106_v13 = vld [vmem:[#allocation5 + $0x160] sm:$0xff]  ;;  %v994_v14 = vpack.c.bf16 %v232_v6, %v230_v4 }
  0x56   :  { %981 = vmatprep.subr.bf16.mxu0 %v980_v28  ;;  %v237_v10 = vld [vmem:[#allocation5 + $0x578] sm:$0xff]  ;;  %v868_v15 = vpack.c.bf16 %v109_v8, %v107_v7  ;;  %v108_v16 = vld [vmem:[#allocation5 + $0x170] sm:$0xff]  ;;  %v234_v17 = vld [vmem:[#allocation5 + $0x560] sm:$0xff] }
  0x57   :  { %v236_v18 = vld [vmem:[#allocation5 + $0x570] sm:$0xff]  ;;  %v996_v19 = vpack.c.bf16 %v237_v10, %v235_v9  ;;  %v111_v20 = vld [vmem:[#allocation5 + $0x188] sm:$0xff]  ;;  %v113_v21 = vld [vmem:[#allocation5 + $0x198] sm:$0xff]  ;;  %v870_v27 = vpack.c.bf16 %v108_v16, %v106_v13 }
  0x58   :  { %855 = vmatpush1.bf16.msra.mxu1 %v854_v34  ;;  %v1307_v22 = vld [vmem:[#allocation2] sm:$0xff]  ;;  %v239_v23 = vld [vmem:[#allocation5 + $0x588] sm:$0xff]  ;;  %v241_v24 = vld [vmem:[#allocation5 + $0x598] sm:$0xff]  ;;  %v998_v29 = vpack.c.bf16 %v236_v18, %v234_v17  ;;  %v872_v30 = vpack.c.bf16 %v113_v21, %v111_v20 }
  0x59   :  { %983 = vmatpush1.bf16.msra.mxu0 %v982_v35  ;;  %857 = vmatprep.subr.bf16.mxu1 %v856_v36  ;;  %v1311_v25 = vrot.slane %v1307_v22, %v1305_v11  ;;  %v1313_v26 = vld [vmem:[#allocation2 + $0x8] sm:$0xff]  ;;  %v110_v31 = vld [vmem:[#allocation5 + $0x180] sm:$0xff]  ;;  %v112_v32 = vld [vmem:[#allocation5 + $0x190] sm:$0xff]  ;;  %v1000_v35 = vpack.c.bf16 %v241_v24, %v239_v23 }
  0x5a   :  { %985 = vmatprep.subr.bf16.mxu0 %v984_v40  ;;  %v1317_v28 = vrot.slane %v1313_v26, %v1305_v11  ;;  %v238_v33 = vld [vmem:[#allocation5 + $0x580] sm:$0xff]  ;;  %v240_v36 = vld [vmem:[#allocation5 + $0x590] sm:$0xff]  ;;  %v115_v37 = vld [vmem:[#allocation5 + $0x1a8] sm:$0xff]  ;;  %v874_v42 = vpack.c.bf16 %v112_v32, %v110_v31 }
  0x5b   :  { %v347_v34 = vcombine.high %v1311_v25, %v1311_v25  ;;  %v117_v38 = vld [vmem:[#allocation5 + $0x1b8] sm:$0xff]  ;;  %v243_v40 = vld [vmem:[#allocation5 + $0x5a8] sm:$0xff]  ;;  %v1002_v43 = vpack.c.bf16 %v240_v36, %v238_v33  ;;  %v114_v45 = vld [vmem:[#allocation5 + $0x1a0] sm:$0xff] }
  0x5c   :  { %859 = vmatpush1.bf16.msra.mxu1 %v858_v49  ;;  %v364_v39 = vcombine.high %v1317_v28, %v1317_v28  ;;  %v245_v41 = vld [vmem:[#allocation5 + $0x5b8] sm:$0xff]  ;;  %v876_v44 = vpack.c.bf16 %v117_v38, %v115_v37  ;;  %v116_v46 = vld [vmem:[#allocation5 + $0x1b0] sm:$0xff]  ;;  %v242_v47 = vld [vmem:[#allocation5 + $0x5a0] sm:$0xff] }
  0x5d   :  { %987 = vmatpush1.bf16.msra.mxu0 %v986_v50  ;;  %861 = vmatprep.subr.bf16.mxu1 %v860_v51  ;;  %v1004_v48 = vpack.c.bf16 %v245_v41, %v243_v40  ;;  %v244_v49 = vld [vmem:[#allocation5 + $0x5b0] sm:$0xff]  ;;  %v119_v50 = vld [vmem:[#allocation5 + $0x1c8] sm:$0xff]  ;;  %v121_v51 = vld [vmem:[#allocation5 + $0x1d8] sm:$0xff]  ;;  %v878_v54 = vpack.c.bf16 %v116_v46, %v114_v45 }
  0x5e   :  { %989 = vmatprep.subr.bf16.mxu0 %v988_v55  ;;  %438 = vmatprep.mubr.f32.mxu1 %v347_v34  ;;  %v247_v52 = vld [vmem:[#allocation5 + $0x5c8] sm:$0xff]  ;;  %v249_v53 = vld [vmem:[#allocation5 + $0x5d8] sm:$0xff]  ;;  %v1006_v55 = vpack.c.bf16 %v244_v49, %v242_v47  ;;  %v880_v56 = vpack.c.bf16 %v121_v51, %v119_v50  ;;  %v118_v57 = vld [vmem:[#allocation5 + $0x1c0] sm:$0xff] }
  0x5f   :  { %580 = vmatprep.mubr.f32.mxu0 %v364_v39  ;;  %v120_v58 = vld [vmem:[#allocation5 + $0x1d0] sm:$0xff]  ;;  %v246_v59 = vld [vmem:[#allocation5 + $0x5c0] sm:$0xff]  ;;  %v1008_v60 = vpack.c.bf16 %v249_v53, %v247_v52  ;;  %v253_v2 = vld [vmem:[#allocation5 + $0x5f8] sm:$0xff] }
  0x60   :  { %863 = vmatpush1.bf16.msra.mxu1 %v862_v63  ;;  %v248_v62 = vld [vmem:[#allocation5 + $0x5d0] sm:$0xff]  ;;  %v123_v63 = vld [vmem:[#allocation5 + $0x1e8] sm:$0xff]  ;;  %v882_v3 = vpack.c.bf16 %v120_v58, %v118_v57  ;;  %v122_v6 = vld [vmem:[#allocation5 + $0x1e0] sm:$0xff] }
  0x61   :  { %991 = vmatpush1.bf16.msra.mxu0 %v990_v0  ;;  %865 = vmatprep.subr.bf16.mxu1 %v864_v1  ;;  %v125_v0 = vld [vmem:[#allocation5 + $0x1f8] sm:$0xff]  ;;  %v251_v1 = vld [vmem:[#allocation5 + $0x5e8] sm:$0xff]  ;;  %v1010_v4 = vpack.c.bf16 %v248_v62, %v246_v59  ;;  %v124_v7 = vld [vmem:[#allocation5 + $0x1f0] sm:$0xff] }
  0x62   :  { %993 = vmatprep.subr.bf16.mxu0 %v992_v5  ;;  %v884_v5 = vpack.c.bf16 %v125_v0, %v123_v63  ;;  %v250_v8 = vld [vmem:[#allocation5 + $0x5e0] sm:$0xff]  ;;  %v1012_v9 = vpack.c.bf16 %v253_v2, %v251_v1  ;;  %v252_v10 = vld [vmem:[#allocation5 + $0x5f0] sm:$0xff]  ;;  %v127_v13 = vld [vmem:[#allocation5 + $0x208] sm:$0xff]  ;;  %v886_v18 = vpack.c.bf16 %v124_v7, %v122_v6 }
  0x63   :  { %v255_v16 = vld [vmem:[#allocation5 + $0x608] sm:$0xff]  ;;  %v257_v17 = vld [vmem:[#allocation5 + $0x618] sm:$0xff]  ;;  %v126_v21 = vld [vmem:[#allocation5 + $0x200] sm:$0xff] }
  0x64   :  { %867 = vmatpush1.bf16.msra.mxu1 %v866_v12  ;;  %v332_v12 = vcombine.high %v1307_v22, %v1307_v22  ;;  %v128_v23 = vld [vmem:[#allocation5 + $0x210] sm:$0xff]  ;;  %v254_v24 = vld [vmem:[#allocation5 + $0x600] sm:$0xff]  ;;  %v131_v22 = vld [vmem:[#allocation5 + $0x228] sm:$0xff] }
  0x65   :  { %995 = vmatpush1.bf16.msra.mxu0 %v994_v14  ;;  %869 = vmatprep.subr.bf16.mxu1 %v868_v15  ;;  %v129_v14 = vld [vmem:[#allocation5 + $0x218] sm:$0xff]  ;;  %v349_v15 = vcombine.high %v1313_v26, %v1313_v26  ;;  %v259_v26 = vld [vmem:[#allocation5 + $0x628] sm:$0xff]  ;;  %v890_v34 = vpack.c.bf16 %v128_v23, %v126_v21  ;;  %v130_v37 = vld [vmem:[#allocation5 + $0x220] sm:$0xff] }
  0x66   :  { %997 = vmatprep.subr.bf16.mxu0 %v996_v19  ;;  %v1014_v19 = vpack.c.bf16 %v252_v10, %v250_v8  ;;  %v888_v20 = vpack.c.bf16 %v129_v14, %v127_v13  ;;  %v1328_v31 = vrot.slane %v332_v12, %v1305_v11  ;;  %v261_v32 = vld [vmem:[#allocation5 + $0x638] sm:$0xff]  ;;  %v132_v38 = vld [vmem:[#allocation5 + $0x230] sm:$0xff]  ;;  %v258_v39 = vld [vmem:[#allocation5 + $0x620] sm:$0xff] }
  0x67   :  { %v1331_v33 = vrot.slane %v349_v15, %v1305_v11  ;;  %v1020_v40 = vpack.c.bf16 %v261_v32, %v259_v26  ;;  %v260_v41 = vld [vmem:[#allocation5 + $0x630] sm:$0xff]  ;;  %v263_v11 = vld [vmem:[#allocation5 + $0x648] sm:$0xff]  ;;  %v265_v45 = vld [vmem:[#allocation5 + $0x658] sm:$0xff]  ;;  %v894_v47 = vpack.c.bf16 %v132_v38, %v130_v37 }
  0x68   :  { %871 = vmatpush1.bf16.msra.mxu1 %v870_v27  ;;  %v1016_v27 = vpack.c.bf16 %v257_v17, %v255_v16  ;;  %v134_v50 = vld [vmem:[#allocation5 + $0x240] sm:$0xff]  ;;  %v136_v51 = vld [vmem:[#allocation5 + $0x250] sm:$0xff]  ;;  %v1024_v53 = vpack.c.bf16 %v265_v45, %v263_v11  ;;  %v269_v57 = vld [vmem:[#allocation5 + $0x678] sm:$0xff] }
  0x69   :  { %999 = vmatpush1.bf16.msra.mxu0 %v998_v29  ;;  %873 = vmatprep.subr.bf16.mxu1 %v872_v30  ;;  %v256_v29 = vld [vmem:[#allocation5 + $0x610] sm:$0xff]  ;;  %v133_v30 = vld [vmem:[#allocation5 + $0x238] sm:$0xff]  ;;  %v365_v46 = vcombine.high %v1331_v33, %v1331_v33  ;;  %v262_v52 = vld [vmem:[#allocation5 + $0x640] sm:$0xff]  ;;  %v898_v58 = vpack.c.bf16 %v136_v51, %v134_v50 }
  0x6a   :  { %1001 = vmatprep.subr.bf16.mxu0 %v1000_v35  ;;  %v1018_v35 = vpack.c.bf16 %v256_v29, %v254_v24  ;;  %v892_v36 = vpack.c.bf16 %v133_v30, %v131_v22  ;;  %v140_v62 = vld [vmem:[#allocation5 + $0x270] sm:$0xff]  ;;  %v266_v63 = vld [vmem:[#allocation5 + $0x660] sm:$0xff]  ;;  %v143_v2 = vld [vmem:[#allocation5 + $0x288] sm:$0xff] }
  0x6b   :  { %v268_v1 = vld [vmem:[#allocation5 + $0x670] sm:$0xff]  ;;  %v270_v12 = vld [vmem:[#allocation5 + $0x680] sm:$0xff]  ;;  %v147_v15 = vld [vmem:[#allocation5 + $0x2a8] sm:$0xff] }
  0x6c   :  { %875 = vmatpush1.bf16.msra.mxu1 %v874_v42  ;;  %v135_v42 = vld [vmem:[#allocation5 + $0x248] sm:$0xff]  ;;  %v1030_v7 = vpack.c.bf16 %v268_v1, %v266_v63  ;;  %v144_v10 = vld [vmem:[#allocation5 + $0x290] sm:$0xff]  ;;  %v149_v16 = vld [vmem:[#allocation5 + $0x2b8] sm:$0xff] }
  0x6d   :  { %1003 = vmatpush1.bf16.msra.mxu0 %v1002_v43  ;;  %877 = vmatprep.subr.bf16.mxu1 %v876_v44  ;;  %v137_v43 = vld [vmem:[#allocation5 + $0x258] sm:$0xff]  ;;  %v348_v44 = vcombine.high %v1328_v31, %v1328_v31  ;;  %v272_v14 = vld [vmem:[#allocation5 + $0x690] sm:$0xff]  ;;  %v275_v17 = vld [vmem:[#allocation5 + $0x6a8] sm:$0xff]  ;;  %v908_v21 = vpack.c.bf16 %v149_v16, %v147_v15 }
  0x6e   :  { %1005 = vmatprep.subr.bf16.mxu0 %v1004_v48  ;;  %v1022_v48 = vpack.c.bf16 %v260_v41, %v258_v39  ;;  %v896_v49 = vpack.c.bf16 %v137_v43, %v135_v42  ;;  %v146_v23 = vld [vmem:[#allocation5 + $0x2a0] sm:$0xff]  ;;  %v148_v24 = vld [vmem:[#allocation5 + $0x2b0] sm:$0xff]  ;;  %v151_v30 = vld [vmem:[#allocation5 + $0x2c8] sm:$0xff] }
  0x6f   :  { %v276_v22 = vld [vmem:[#allocation5 + $0x6b0] sm:$0xff]  ;;  %v153_v26 = vld [vmem:[#allocation5 + $0x2d8] sm:$0xff]  ;;  %v279_v32 = vld [vmem:[#allocation5 + $0x6c8] sm:$0xff] }
  0x70   :  { %879 = vmatpush1.bf16.msra.mxu1 %v878_v54  ;;  %v264_v54 = vld [vmem:[#allocation5 + $0x650] sm:$0xff]  ;;  %v912_v37 = vpack.c.bf16 %v153_v26, %v151_v30  ;;  %v150_v38 = vld [vmem:[#allocation5 + $0x2c0] sm:$0xff]  ;;  %v155_v43 = vld [vmem:[#allocation5 + $0x2e8] sm:$0xff] }
  0x71   :  { %1007 = vmatpush1.bf16.msra.mxu0 %v1006_v55  ;;  %881 = vmatprep.subr.bf16.mxu1 %v880_v56  ;;  %v141_v55 = vld [vmem:[#allocation5 + $0x278] sm:$0xff]  ;;  %v267_v56 = vld [vmem:[#allocation5 + $0x668] sm:$0xff]  ;;  %v152_v39 = vld [vmem:[#allocation5 + $0x2d0] sm:$0xff] }
  0x72   :  { %1009 = vmatprep.subr.bf16.mxu0 %v1008_v60  ;;  %v138_v60 = vld [vmem:[#allocation5 + $0x260] sm:$0xff]  ;;  %v1028_v0 = vpack.c.bf16 %v269_v57, %v267_v56  ;;  %v280_v42 = vld [vmem:[#allocation5 + $0x6d0] sm:$0xff]  ;;  %v283_v11 = vld [vmem:[#allocation5 + $0x6e8] sm:$0xff] }
  0x73   :  { %v902_v6 = vpack.c.bf16 %v140_v62, %v138_v60  ;;  %v285_v45 = vld [vmem:[#allocation5 + $0x6f8] sm:$0xff]  ;;  %v156_v50 = vld [vmem:[#allocation5 + $0x2f0] sm:$0xff]  ;;  %v282_v51 = vld [vmem:[#allocation5 + $0x6e0] sm:$0xff] }
  0x74   :  { %883 = vmatpush1.bf16.msra.mxu1 %v882_v3  ;;  %v145_v3 = vld [vmem:[#allocation5 + $0x298] sm:$0xff]  ;;  %v160_v60 = vld [vmem:[#allocation5 + $0x310] sm:$0xff]  ;;  %v286_v62 = vld [vmem:[#allocation5 + $0x700] sm:$0xff] }
  0x75   :  { %1011 = vmatpush1.bf16.msra.mxu0 %v1010_v4  ;;  %885 = vmatprep.subr.bf16.mxu1 %v884_v5  ;;  %v271_v4 = vld [vmem:[#allocation5 + $0x688] sm:$0xff]  ;;  %v273_v5 = vld [vmem:[#allocation5 + $0x698] sm:$0xff]  ;;  %v904_v8 = vpack.c.bf16 %v145_v3, %v143_v2 }
  0x76   :  { %1013 = vmatprep.subr.bf16.mxu0 %v1012_v9  ;;  %v142_v9 = vld [vmem:[#allocation5 + $0x280] sm:$0xff]  ;;  %v1032_v13 = vpack.c.bf16 %v273_v5, %v271_v4  ;;  %v289_v56 = vld [vmem:[#allocation5 + $0x718] sm:$0xff]  ;;  %v163_v1 = vld [vmem:[#allocation5 + $0x328] sm:$0xff] }
  0x77   :  { %v165_v2 = vld [vmem:[#allocation5 + $0x338] sm:$0xff]  ;;  %v291_v3 = vld [vmem:[#allocation5 + $0x728] sm:$0xff] }
  0x78   :  { %887 = vmatpush1.bf16.msra.mxu1 %v886_v18  ;;  %v277_v18 = vld [vmem:[#allocation5 + $0x6b8] sm:$0xff]  ;;  %v295_v16 = vld [vmem:[#allocation5 + $0x748] sm:$0xff] }
  0x79   :  { %1015 = vmatpush1.bf16.msra.mxu0 %v1014_v19  ;;  %889 = vmatprep.subr.bf16.mxu1 %v888_v20  ;;  %v906_v19 = vpack.c.bf16 %v144_v10, %v142_v9  ;;  %v1034_v20 = vpack.c.bf16 %v272_v14, %v270_v12  ;;  %v1036_v29 = vpack.c.bf16 %v277_v18, %v275_v17  ;;  %v293_v4 = vld [vmem:[#allocation5 + $0x738] sm:$0xff]  ;;  %v164_v9 = vld [vmem:[#allocation5 + $0x330] sm:$0xff]  ;;  %v290_v10 = vld [vmem:[#allocation5 + $0x720] sm:$0xff] }
  0x7a   :  { %1017 = vmatprep.subr.bf16.mxu0 %v1016_v27  ;;  %v274_v27 = vld [vmem:[#allocation5 + $0x6a0] sm:$0xff]  ;;  %v1052_v12 = vpack.c.bf16 %v293_v4, %v291_v3  ;;  %v167_v14 = vld [vmem:[#allocation5 + $0x348] sm:$0xff]  ;;  %v169_v15 = vld [vmem:[#allocation5 + $0x358] sm:$0xff] }
  0x7b   :  { %439 = vmatmul.mubr.f32.vlgmr.msra.gmra.mrb[0].mxu1 %v1311_v25  ;;  %v139_v25 = vld [vmem:[#allocation5 + $0x268] sm:$0xff]  ;;  %v297_v17 = vld [vmem:[#allocation5 + $0x758] sm:$0xff] }
  0x7c   :  { %891 = vmatpush1.bf16.msra.mxu1 %v890_v34  ;;  %581 = vmatmul.mubr.f32.vlgmr.msra.gmra.mrb[0].mxu0 %v1317_v28  ;;  %v1026_v28 = vpack.c.bf16 %v264_v54, %v262_v52  ;;  %v900_v59 = vpack.c.bf16 %v141_v55, %v139_v25  ;;  %v281_v34 = vld [vmem:[#allocation5 + $0x6d8] sm:$0xff]  ;;  %v1044_v52 = vpack.c.bf16 %v285_v45, %v283_v11  ;;  %v159_v54 = vld [vmem:[#allocation5 + $0x308] sm:$0xff] }
  0x7d   :  { %1019 = vmatpush1.bf16.msra.mxu0 %v1018_v35  ;;  %893 = vmatprep.subr.bf16.mxu1 %v892_v36  ;;  %v910_v35 = vpack.c.bf16 %v148_v24, %v146_v23  ;;  %v1038_v36 = vpack.c.bf16 %v276_v22, %v274_v27  ;;  %v1040_v41 = vpack.c.bf16 %v281_v34, %v279_v32  ;;  %v161_v25 = vld [vmem:[#allocation5 + $0x318] sm:$0xff]  ;;  %v287_v55 = vld [vmem:[#allocation5 + $0x708] sm:$0xff]  ;;  %v168_v23 = vld [vmem:[#allocation5 + $0x350] sm:$0xff] }
  0x7e   :  { %1021 = vmatprep.subr.bf16.mxu0 %v1020_v40  ;;  %509 = vmatprep.mubr.f32.mxu1 %v348_v44  ;;  %v278_v40 = vld [vmem:[#allocation5 + $0x6c0] sm:$0xff]  ;;  %v157_v44 = vld [vmem:[#allocation5 + $0x2f8] sm:$0xff]  ;;  %v1048_v63 = vpack.c.bf16 %v289_v56, %v287_v55  ;;  %v1056_v27 = vpack.c.bf16 %v297_v17, %v295_v16  ;;  %v171_v22 = vld [vmem:[#allocation5 + $0x368] sm:$0xff] }
  0x7f   :  { %651 = vmatprep.mubr.f32.mxu0 %v365_v46  ;;  %v914_v46 = vpack.c.bf16 %v152_v39, %v150_v38  ;;  %v294_v24 = vld [vmem:[#allocation5 + $0x740] sm:$0xff]  ;;  %v173_v30 = vld [vmem:[#allocation5 + $0x378] sm:$0xff]  ;;  %v299_v26 = vld [vmem:[#allocation5 + $0x768] sm:$0xff] }
  0x80   :  { %895 = vmatpush1.bf16.msra.mxu1 %v894_v47  ;;  %v1042_v47 = vpack.c.bf16 %v280_v42, %v278_v40  ;;  %v301_v32 = vld [vmem:[#allocation5 + $0x778] sm:$0xff]  ;;  %v172_v38 = vld [vmem:[#allocation5 + $0x370] sm:$0xff]  ;;  %v298_v39 = vld [vmem:[#allocation5 + $0x760] sm:$0xff] }
  0x81   :  { %1023 = vmatpush1.bf16.msra.mxu0 %v1022_v48  ;;  %897 = vmatprep.subr.bf16.mxu1 %v896_v49  ;;  %v916_v48 = vpack.c.bf16 %v157_v44, %v155_v43  ;;  %v154_v49 = vld [vmem:[#allocation5 + $0x2e0] sm:$0xff]  ;;  %v1060_v40 = vpack.c.bf16 %v301_v32, %v299_v26  ;;  %v175_v42 = vld [vmem:[#allocation5 + $0x388] sm:$0xff]  ;;  %v177_v43 = vld [vmem:[#allocation5 + $0x398] sm:$0xff] }
  0x82   :  { %1025 = vmatprep.subr.bf16.mxu0 %v1024_v53  ;;  %v284_v53 = vld [vmem:[#allocation5 + $0x6f0] sm:$0xff]  ;;  %v918_v57 = vpack.c.bf16 %v156_v50, %v154_v49  ;;  %v303_v44 = vld [vmem:[#allocation5 + $0x788] sm:$0xff]  ;;  %v305_v11 = vld [vmem:[#allocation5 + $0x798] sm:$0xff] }
  0x83   :  { %v176_v49 = vld [vmem:[#allocation5 + $0x390] sm:$0xff]  ;;  %v302_v50 = vld [vmem:[#allocation5 + $0x780] sm:$0xff]  ;;  %v309_v55 = vld [vmem:[#allocation5 + $0x7b8] sm:$0xff] }
  0x84   :  { %899 = vmatpush1.bf16.msra.mxu1 %v898_v58  ;;  %v1046_v58 = vpack.c.bf16 %v284_v53, %v282_v51  ;;  %v1064_v51 = vpack.c.bf16 %v305_v11, %v303_v44  ;;  %v179_v53 = vld [vmem:[#allocation5 + $0x3a8] sm:$0xff]  ;;  %v313_v3 = vld [vmem:[#allocation5 + $0x7d8] sm:$0xff] }
  0x85   :  { %1027 = vmatpush1.bf16.msra.mxu0 %v1026_v28  ;;  %901 = vmatprep.subr.bf16.mxu1 %v900_v59  ;;  %v920_v28 = vpack.c.bf16 %v161_v25, %v159_v54  ;;  %v158_v59 = vld [vmem:[#allocation5 + $0x300] sm:$0xff]  ;;  %v181_v54 = vld [vmem:[#allocation5 + $0x3b8] sm:$0xff]  ;;  %v307_v25 = vld [vmem:[#allocation5 + $0x7a8] sm:$0xff] }
  0x86   :  { %1029 = vmatprep.subr.bf16.mxu0 %v1028_v0  ;;  %v288_v0 = vld [vmem:[#allocation5 + $0x710] sm:$0xff]  ;;  %v922_v5 = vpack.c.bf16 %v160_v60, %v158_v59  ;;  %v306_v60 = vld [vmem:[#allocation5 + $0x7a0] sm:$0xff]  ;;  %v317_v16 = vld [vmem:[#allocation5 + $0x7f8] sm:$0xff] }
  0x87   :  { %v180_v59 = vld [vmem:[#allocation5 + $0x3b0] sm:$0xff] }
  0x88   :  { %903 = vmatpush1.bf16.msra.mxu1 %v902_v6  ;;  %v1050_v6 = vpack.c.bf16 %v288_v0, %v286_v62  ;;  %v1068_v62 = vpack.c.bf16 %v309_v55, %v307_v25  ;;  %v183_v0 = vld [vmem:[#allocation5 + $0x3c8] sm:$0xff]  ;;  %v670_v25 = vld [vmem:[#allocation7 + $0x40] sm:$0xff] }
  0x89   :  { %1031 = vmatpush1.bf16.msra.mxu0 %v1030_v7  ;;  %905 = vmatprep.subr.bf16.mxu1 %v904_v8  ;;  %v924_v7 = vpack.c.bf16 %v165_v2, %v163_v1  ;;  %v162_v8 = vld [vmem:[#allocation5 + $0x320] sm:$0xff]  ;;  %v185_v1 = vld [vmem:[#allocation5 + $0x3d8] sm:$0xff]  ;;  %v311_v2 = vld [vmem:[#allocation5 + $0x7c8] sm:$0xff] }
  0x8a   :  { %1033 = vmatprep.subr.bf16.mxu0 %v1032_v13  ;;  %v292_v13 = vld [vmem:[#allocation5 + $0x730] sm:$0xff]  ;;  %v926_v18 = vpack.c.bf16 %v164_v9, %v162_v8  ;;  %v310_v9 = vld [vmem:[#allocation5 + $0x7c0] sm:$0xff]  ;;  %v671_v55 = vld [vmem:[#allocation7 + $0x48] sm:$0xff] }
  0x8b   :  { %v184_v8 = vld [vmem:[#allocation5 + $0x3d0] sm:$0xff] }
  0x8c   :  { %907 = vmatpush1.bf16.msra.mxu1 %v906_v19  ;;  %v1054_v19 = vpack.c.bf16 %v292_v13, %v290_v10  ;;  %v1072_v10 = vpack.c.bf16 %v313_v3, %v311_v2  ;;  %v187_v13 = vld [vmem:[#allocation5 + $0x3e8] sm:$0xff]  ;;  %v674_v2 = vld [vmem:[#allocation7 + $0x60] sm:$0xff] }
  0x8d   :  { %1035 = vmatpush1.bf16.msra.mxu0 %v1034_v20  ;;  %909 = vmatprep.subr.bf16.mxu1 %v908_v21  ;;  %v928_v20 = vpack.c.bf16 %v169_v15, %v167_v14  ;;  %v166_v21 = vld [vmem:[#allocation5 + $0x340] sm:$0xff]  ;;  %v189_v14 = vld [vmem:[#allocation5 + $0x3f8] sm:$0xff]  ;;  %v315_v15 = vld [vmem:[#allocation5 + $0x7e8] sm:$0xff] }
  0x8e   :  { %1037 = vmatprep.subr.bf16.mxu0 %v1036_v29  ;;  %v296_v29 = vld [vmem:[#allocation5 + $0x750] sm:$0xff]  ;;  %v930_v34 = vpack.c.bf16 %v168_v23, %v166_v21  ;;  %v314_v23 = vld [vmem:[#allocation5 + $0x7e0] sm:$0xff]  ;;  %v675_v3 = vld [vmem:[#allocation7 + $0x68] sm:$0xff] }
  0x8f   :  { %v188_v21 = vld [vmem:[#allocation5 + $0x3f0] sm:$0xff] }
  0x90   :  { %911 = vmatpush1.bf16.msra.mxu1 %v910_v35  ;;  %v1058_v35 = vpack.c.bf16 %v296_v29, %v294_v24  ;;  %v1076_v24 = vpack.c.bf16 %v317_v16, %v315_v15  ;;  %v678_v29 = vld [vmem:[#allocation7 + $0x80] sm:$0xff] }
  0x91   :  { %1039 = vmatpush1.bf16.msra.mxu0 %v1038_v36  ;;  %913 = vmatprep.subr.bf16.mxu1 %v912_v37  ;;  %v932_v36 = vpack.c.bf16 %v173_v30, %v171_v22  ;;  %v170_v37 = vld [vmem:[#allocation5 + $0x360] sm:$0xff]  ;;  %v679_v22 = vld [vmem:[#allocation7 + $0x88] sm:$0xff] }
  0x92   :  { %1041 = vmatprep.subr.bf16.mxu0 %v1040_v41  ;;  %v300_v41 = vld [vmem:[#allocation5 + $0x770] sm:$0xff]  ;;  %v934_v45 = vpack.c.bf16 %v172_v38, %v170_v37  ;;  %v1080_v32 = vpack.c.bf16 %v679_v22, %v678_v29  ;;  %v681_v37 = vld [vmem:[#allocation7 + $0x98] sm:$0xff] }
  0x94   :  { %915 = vmatpush1.bf16.msra.mxu1 %v914_v46  ;;  %v1062_v46 = vpack.c.bf16 %v300_v41, %v298_v39  ;;  %v665_v41 = vld [vmem:[#allocation7 + $0x18] sm:$0xff] }
  0x95   :  { %1043 = vmatpush1.bf16.msra.mxu0 %v1042_v47  ;;  %917 = vmatprep.subr.bf16.mxu1 %v916_v48  ;;  %v936_v47 = vpack.c.bf16 %v177_v43, %v175_v42  ;;  %v174_v48 = vld [vmem:[#allocation5 + $0x380] sm:$0xff]  ;;  %v683_v43 = vld [vmem:[#allocation7 + $0xa8] sm:$0xff] }
  0x96   :  { %1045 = vmatprep.subr.bf16.mxu0 %v1044_v52  ;;  %v304_v52 = vld [vmem:[#allocation5 + $0x790] sm:$0xff]  ;;  %v938_v56 = vpack.c.bf16 %v176_v49, %v174_v48  ;;  %v682_v42 = vld [vmem:[#allocation7 + $0xa0] sm:$0xff]  ;;  %v685_v49 = vld [vmem:[#allocation7 + $0xb8] sm:$0xff] }
  0x97   :  { %v1088_v11 = vpack.c.bf16 %v683_v43, %v682_v42  ;;  %v684_v48 = vld [vmem:[#allocation7 + $0xb0] sm:$0xff] }
  0x98   :  { %919 = vmatpush1.bf16.msra.mxu1 %v918_v57  ;;  %v1066_v57 = vpack.c.bf16 %v304_v52, %v302_v50  ;;  %v1092_v50 = vpack.c.bf16 %v685_v49, %v684_v48  ;;  %v669_v52 = vld [vmem:[#allocation7 + $0x38] sm:$0xff] }
  0x99   :  { %1047 = vmatpush1.bf16.msra.mxu0 %v1046_v58  ;;  %921 = vmatprep.subr.bf16.mxu1 %v920_v28  ;;  %v940_v58 = vpack.c.bf16 %v181_v54, %v179_v53  ;;  %v178_v28 = vld [vmem:[#allocation5 + $0x3a0] sm:$0xff] }
  0x9a   :  { %1049 = vmatprep.subr.bf16.mxu0 %v1048_v63  ;;  %v308_v63 = vld [vmem:[#allocation5 + $0x7b0] sm:$0xff]  ;;  %v942_v4 = vpack.c.bf16 %v180_v59, %v178_v28 }
  0x9b   :  { %v672_v59 = vld [vmem:[#allocation7 + $0x50] sm:$0xff] }
  0x9c   :  { %923 = vmatpush1.bf16.msra.mxu1 %v922_v5  ;;  %v1070_v5 = vpack.c.bf16 %v308_v63, %v306_v60  ;;  %v673_v60 = vld [vmem:[#allocation7 + $0x58] sm:$0xff]  ;;  %v690_v63 = vld [vmem:[#allocation7 + $0xe0] sm:$0xff] }
  0x9d   :  { %1051 = vmatpush1.bf16.msra.mxu0 %v1050_v6  ;;  %925 = vmatprep.subr.bf16.mxu1 %v924_v7  ;;  %v944_v6 = vpack.c.bf16 %v185_v1, %v183_v0  ;;  %v182_v7 = vld [vmem:[#allocation5 + $0x3c0] sm:$0xff]  ;;  %v691_v0 = vld [vmem:[#allocation7 + $0xe8] sm:$0xff] }
  0x9e   :  { %1053 = vmatprep.subr.bf16.mxu0 %v1052_v12  ;;  %v312_v12 = vld [vmem:[#allocation5 + $0x7d0] sm:$0xff]  ;;  %v946_v17 = vpack.c.bf16 %v184_v8, %v182_v7  ;;  %v1104_v1 = vpack.c.bf16 %v691_v0, %v690_v63 }
  0x9f   :  { %v676_v8 = vld [vmem:[#allocation7 + $0x70] sm:$0xff] }
  0xa0   :  { %927 = vmatpush1.bf16.msra.mxu1 %v926_v18  ;;  %v1074_v18 = vpack.c.bf16 %v312_v12, %v310_v9  ;;  %v677_v9 = vld [vmem:[#allocation7 + $0x78] sm:$0xff]  ;;  %v322_v12 = vsub.s32 0, %v1302_v61 }
  0xa1   :  { %1055 = vmatpush1.bf16.msra.mxu0 %v1054_v19  ;;  %929 = vmatprep.subr.bf16.mxu1 %v928_v20  ;;  %v948_v19 = vpack.c.bf16 %v189_v14, %v187_v13  ;;  %v186_v20 = vld [vmem:[#allocation5 + $0x3e0] sm:$0xff]  ;;  %v318_v13 = vld [vmem:[%s1363_s2] sm:$0x3]  ;;  %v326_v14 = vsub.s32 1, %v1302_v61 }
  0xa2   :  { %1057 = vmatprep.subr.bf16.mxu0 %v1056_v27  ;;  %v316_v27 = vld [vmem:[#allocation5 + $0x7f0] sm:$0xff]  ;;  %v950_v30 = vpack.c.bf16 %v188_v21, %v186_v20  ;;  %v323_v15 = vrot.slane %v318_v13, %v322_v12 }
  0xa3   :  { %v1078_v26 = vpack.c.bf16 %v316_v27, %v314_v23  ;;  %v327_v16 = vrot.slane %v318_v13, %v326_v14  ;;  %v788_v61 = vld [vmem:[%s1365_s4] ss:$0 sm:$0xff] }
  0xa4   :  { %931 = vmatpush1.bf16.msra.mxu1 %v930_v34  ;;  %v662_v34 = vld [vmem:[#allocation7] sm:$0xff] }
  0xa5   :  { %1059 = vmatpush1.bf16.msra.mxu0 %v1058_v35  ;;  %933 = vmatprep.subr.bf16.mxu1 %v932_v36  ;;  %v663_v35 = vld [vmem:[#allocation7 + $0x8] sm:$0xff]  ;;  %v680_v36 = vld [vmem:[#allocation7 + $0x90] sm:$0xff] }
  0xa6   :  { %1061 = vmatprep.subr.bf16.mxu0 %v1060_v40  ;;  %v1082_v38 = vpack.c.bf16 %v663_v35, %v662_v34  ;;  %v1084_v39 = vpack.c.bf16 %v681_v37, %v680_v36  ;;  %v664_v40 = vld [vmem:[#allocation7 + $0x10] sm:$0xff] }
  0xa7   :  { %v1086_v44 = vpack.c.bf16 %v665_v41, %v664_v40 }
  0xa8   :  { %935 = vmatpush1.bf16.msra.mxu1 %v934_v45  ;;  %v666_v45 = vld [vmem:[#allocation7 + $0x20] sm:$0xff] }
  0xa9   :  { %1063 = vmatpush1.bf16.msra.mxu0 %v1062_v46  ;;  %937 = vmatprep.subr.bf16.mxu1 %v936_v47  ;;  %v667_v46 = vld [vmem:[#allocation7 + $0x28] sm:$0xff] }
  0xaa   :  { %1065 = vmatprep.subr.bf16.mxu0 %v1064_v51  ;;  %v1090_v47 = vpack.c.bf16 %v667_v46, %v666_v45  ;;  %v668_v51 = vld [vmem:[#allocation7 + $0x30] sm:$0xff] }
  0xab   :  { %v1094_v53 = vpack.c.bf16 %v669_v52, %v668_v51 }
  0xac   :  { %939 = vmatpush1.bf16.msra.mxu1 %v938_v56  ;;  %v1098_v56 = vpack.c.bf16 %v671_v55, %v670_v25 }
  0xad   :  { %1067 = vmatpush1.bf16.msra.mxu0 %v1066_v57  ;;  %941 = vmatprep.subr.bf16.mxu1 %v940_v58  ;;  %v688_v57 = vld [vmem:[#allocation7 + $0xd0] sm:$0xff]  ;;  %v689_v58 = vld [vmem:[#allocation7 + $0xd8] sm:$0xff] }
  0xae   :  { %1069 = vmatprep.subr.bf16.mxu0 %v1068_v62  ;;  %v1100_v28 = vpack.c.bf16 %v689_v58, %v688_v57  ;;  %v1102_v62 = vpack.c.bf16 %v673_v60, %v672_v59 }
  0xb0   :  { %943 = vmatpush1.bf16.msra.mxu1 %v942_v4  ;;  %v1106_v4 = vpack.c.bf16 %v675_v3, %v674_v2 }
  0xb1   :  { %1071 = vmatpush1.bf16.msra.mxu0 %v1070_v5  ;;  %945 = vmatprep.subr.bf16.mxu1 %v944_v6  ;;  %v692_v5 = vld [vmem:[#allocation7 + $0xf0] sm:$0xff]  ;;  %v693_v6 = vld [vmem:[#allocation7 + $0xf8] sm:$0xff] }
  0xb2   :  { %1073 = vmatprep.subr.bf16.mxu0 %v1072_v10  ;;  %v1108_v7 = vpack.c.bf16 %v693_v6, %v692_v5  ;;  %v1110_v10 = vpack.c.bf16 %v677_v9, %v676_v8 }
  0xb4   :  { %947 = vmatpush1.bf16.msra.mxu1 %v946_v17 }
  0xb5   :  { %1075 = vmatpush1.bf16.msra.mxu0 %v1074_v18  ;;  %949 = vmatprep.subr.bf16.mxu1 %v948_v19 }
  0xb6   :  { %1077 = vmatprep.subr.bf16.mxu0 %v1076_v24 }
  0xb8   :  { %951 = vmatpush1.bf16.msra.mxu1 %v950_v30 }
  0xb9   :  { %1079 = vmatpush1.bf16.msra.mxu0 %v1078_v26  ;;  %1081 = vmatprep.subr.bf16.mxu1 %v1080_v32 }
  0xbb   :  { %510 = vmatmul.mubr.f32.vlgmr.msra.gmra.mrb[0].mxu1 %v1328_v31  ;;  %v686_v31 = vld [vmem:[#allocation7 + $0xc0] sm:$0xff] }
  0xbc   :  { %652 = vmatmul.mubr.f32.vlgmr.msra.gmra.mrb[0].mxu0 %v1331_v33  ;;  %1083 = vmatpush3.bf16.msra.mxu1 %v1082_v38  ;;  %v687_v33 = vld [vmem:[#allocation7 + $0xc8] sm:$0xff] }
  0xbd   :  { %1085 = vmatprep.subr.bf16.mxu1 %v1084_v39  ;;  %v1096_v54 = vpack.c.bf16 %v687_v33, %v686_v31 }
  0xc0   :  { %1087 = vmatpush3.bf16.msra.mxu1 %v1086_v44 }
  0xc1   :  { %1089 = vmatprep.subr.bf16.mxu1 %v1088_v11 }
  0xc4   :  { %1091 = vmatpush3.bf16.msra.mxu1 %v1090_v47 }
  0xc5   :  { %1093 = vmatprep.subr.bf16.mxu1 %v1092_v50 }
  0xc8   :  { %1095 = vmatpush3.bf16.msra.mxu1 %v1094_v53 }
  0xc9   :  { %1097 = vmatprep.subr.bf16.mxu1 %v1096_v54 }
  0xcc   :  { %1099 = vmatpush3.bf16.msra.mxu1 %v1098_v56 }
  0xcd   :  { %1101 = vmatprep.subr.bf16.mxu1 %v1100_v28 }
  0xd0   :  { %1103 = vmatpush3.bf16.msra.mxu1 %v1102_v62 }
  0xd1   :  { %1105 = vmatprep.subr.bf16.mxu1 %v1104_v1 }
  0xd4   :  { %1107 = vmatpush3.bf16.msra.mxu1 %v1106_v4 }
  0xd5   :  { %1109 = vmatprep.subr.bf16.mxu1 %v1108_v7 }
  0xd8   :  { %1111 = vmatpush3.bf16.msra.mxu1 %v1110_v10 }
 0x18e   :  { %v511_v17 = vpop.f32.mrb[0].mxu1 }
 0x18f   :  { %v1112_v18 = vadd.f32 %v511_v17, %v323_v15  ;;  %v653_v19 = vpop.f32.mrb[0].mxu0  ;;  %v513_v20 = vpop.f32.mrb[1].mxu1 }
 0x190   :  { %v1114_v21 = vadd.f32 %v513_v20, %v327_v16  ;;  %v655_v23 = vpop.f32.mrb[1].mxu0 }
 0x191   :  { %v1113_v24 = vadd.f32 %v1112_v18, %v653_v19 }
 0x192   :  { %v1115_v27 = vadd.f32 %v1114_v21, %v655_v23 }
 0x193   :  { %1131 = vtanh.f32 %v1113_v24 }
 0x19d   :  { %v1132_v29 = vpop.eup %1131 }
 0x19e   :  { %v659_v22 = vmul.f32 %v1132_v29, %v1132_v29  ;;  %765 = vmatprep.mubr.f32.mxu1 %v1132_v29 }
 0x1a0   :  { %v660_v30 = vsub.f32 1.0, %v659_v22 }
 0x1a2   :  { %v661_v26 = vmul.f32 %v1115_v27, %v660_v30 }
 0x1a4   :  { %766 = vmatmul.mubr.f32.vlgmr.msra.gmra.mrb[2].mxu1 %v661_v26 }
 0x277   :  { %v821_v32 = vpop.f32.mrb[2].mxu1 }
 0x278   :  { %v822_v34 = vpop.f32.mrb[3].mxu1 }
 0x279   :  { %v823_v35 = vadd.f32 %v822_v34, %v821_v32 }
 0x27b   :  { %v768_v36 = vadd.f32 %v823_v35, %v788_v61 }
 0x27d   :  { %771 = vst [vmem:[#allocation8] sm:$0x3] %v768_v36 }
 0x27e   :  { %1210 = shalt.err (!%p1207_p0)
}
 0x27f   :  { %s1211_s13 = scalar_lea.hbm %s1366_s5, 32 }
 0x280   :  { %p1212_p1 = scmp.ne.s32.totalorder %s1366_s5, %s1211_s13  ;;  %p1215_p2 = scmp.lt.u32.totalorder %s1211_s13, %s1366_s5 }
 0x282   :  { %p1217_p3 = pnand %p1215_p2, %p1212_p1 }
 0x284   :  { %1220 = shalt.err (!%p1217_p3)
}
 0x285   :  { %781 = dma.vmem_to_hbm [thread:$0]  %s779_s9, 32, %s1366_s5, [#allocation4]  }
 0x286   :  { %1225 = dma.done.wait [#allocation4], 32  }
 0x287   :  { %1226 = vsyncadd [#allocation4], 4294967264 }
 0x288   :  { %785 = vsyncpa [#allocation3], 1 }
 0x289   :  { %786 = vsyncpa [#allocation6], 1 }
 0x28a   :  { %787 = vsyncpa [#allocation4], 1 }

</bundles_post_ra>
